<compile_context>
chip_gen: v7x
topology: tpu7x:2x2x1
jax: 0.10.0
libtpu: 0.0.40
codegen_flags: <defaults>
</compile_context>

<pallas_src>
import functools

import jax
import jax.numpy as jnp
from jax import lax
from jax.experimental import pallas as pl
from jax.experimental.pallas import tpu as pltpu

_MIB = 1024 * 1024


# -----------------------------------------------------------------------------
# VMEM budgeting & tile pickers
# -----------------------------------------------------------------------------
def _vmem_budget_bytes():
    """Per-kernel working budget used for tile picking (incl. double buffers)."""
    try:
        cap = pltpu.get_tpu_info().vmem_capacity_bytes   # 64 MiB v7x, 128 MiB v5e/v6e
    except Exception:
        cap = 64 * _MIB
    return min(cap // 2, 32 * _MIB)    # stay inside default scoped limits everywhere


def _vmem_limit(est_bytes):
    """Explicit scoped-VMEM limit with headroom, clamped to v7x physical VMEM."""
    return int(min(64 * _MIB, max(32 * _MIB, est_bytes + 16 * _MIB)))


def _pick_col_tile(e_in, e_out, itemsize, n_mats, budget):
    """Output-column tile: multiple of 128 (or full e_out), weight block fits budget."""
    if e_out % 128 != 0:
        return e_out
    tn = 128
    while (tn * 2 <= e_out and tn * 2 <= 1024
           and 2 * n_mats * e_in * (tn * 2) * itemsize <= budget):
        tn *= 2
    return tn


def _pick_row_tile(m, bytes_per_row, budget):
    """Row tile: multiple of 8 (or full m), up to 512, sized to budget."""
    if m <= 8 or m % 8 != 0:
        return m
    tm = 8
    while (tm * 2 <= m and tm * 2 <= 512
           and 2 * (tm * 2) * bytes_per_row <= budget):
        tm *= 2
    return tm


def _pick_heads_per_block(num_heads, head_dim):
    """Smallest head group whose lane width is a multiple of 128, else all heads."""
    for hb in range(1, num_heads + 1):
        if num_heads % hb == 0 and (hb * head_dim) % 128 == 0:
            return hb
    return num_heads


def _pick_kv_tile(s):
    """KV-sequence tile: divisor of s, multiple of 8, <= 512 (full s when small)."""
    if s <= 512:
        return s
    for ts in (512, 256, 128, 64, 32, 16, 8):
        if s % ts == 0:
            return ts
    return s


# -----------------------------------------------------------------------------
# One-time parameter preparation (hoisted out of the per-call forward).
# Folds the attention scaling into the q projection.
# -----------------------------------------------------------------------------
def prepare_params(raw, num_heads, dtype=jnp.float32):
    E = raw["q_w"].shape[0]
    assert E % num_heads == 0
    scaling = (E // num_heads) ** (-0.5)
    w_qkv = jnp.stack([raw["q_w"] * scaling, raw["k_w"], raw["v_w"]]).astype(dtype)
    b_qkv = jnp.stack([raw["q_b"] * scaling, raw["k_b"], raw["v_b"]])
    return {
        "w_qkv": w_qkv,                                    # (3, E, E)
        "b_qkv": b_qkv.reshape(3, 1, E).astype(dtype),     # (3, 1, E)
        "o_w": raw["o_w"].astype(dtype),                   # (E, E)
        "o_b": raw["o_b"].reshape(1, E).astype(dtype),     # (1, E)
    }


# -----------------------------------------------------------------------------
# Fused QKV projection: q = x@Wq + bq ; k = x@Wk + bk ; v = x@Wv + bv
# Grid (M rows, N cols): x row tile revisited across the N axis (one DMA per
# row tile); the stacked weight streams in as (3, E, tn) column blocks.
# -----------------------------------------------------------------------------
def _qkv_kernel(x_ref, w_ref, b_ref, q_ref, k_ref, v_ref):
    x = x_ref[...]                                                  # (tm, E)
    q_ref[...] = (jnp.dot(x, w_ref[0], preferred_element_type=jnp.float32)
                  + b_ref[0]).astype(q_ref.dtype)
    k_ref[...] = (jnp.dot(x, w_ref[1], preferred_element_type=jnp.float32)
                  + b_ref[1]).astype(k_ref.dtype)
    v_ref[...] = (jnp.dot(x, w_ref[2], preferred_element_type=jnp.float32)
                  + b_ref[2]).astype(v_ref.dtype)


def qkv_proj(x, w_qkv, b_qkv):
    """x: (M, E); w_qkv: (3, E, E); b_qkv: (3, 1, E) -> (q, k, v), each (M, E)."""
    M, E = x.shape
    itemsize = x.dtype.itemsize
    budget = _vmem_budget_bytes()
    tn = _pick_col_tile(E, E, itemsize, n_mats=3, budget=budget // 2)
    tm = _pick_row_tile(M, (E + 3 * tn) * itemsize, budget=budget // 2)
    est = 2 * itemsize * (tm * E + 3 * E * tn + 3 * tn + 3 * tm * tn)
    out = jax.ShapeDtypeStruct((M, E), x.dtype)
    return pl.pallas_call(
        _qkv_kernel,
        out_shape=(out, out, out),
        grid_spec=pltpu.PrefetchScalarGridSpec(
            num_scalar_prefetch=0,
            grid=(pl.cdiv(M, tm), pl.cdiv(E, tn)),
            in_specs=[
                pl.BlockSpec((tm, E), lambda i, j: (i, 0)),        # revisited over j
                pl.BlockSpec((3, E, tn), lambda i, j: (0, 0, j)),  # streamed columns
                pl.BlockSpec((3, 1, tn), lambda i, j: (0, 0, j)),
            ],
            out_specs=[
                pl.BlockSpec((tm, tn), lambda i, j: (i, j)),
                pl.BlockSpec((tm, tn), lambda i, j: (i, j)),
                pl.BlockSpec((tm, tn), lambda i, j: (i, j)),
            ],
        ),
        compiler_params=pltpu.CompilerParams(
            dimension_semantics=("parallel", "parallel"),
            vmem_limit_bytes=_vmem_limit(est)),
    )(x, w_qkv, b_qkv)


# -----------------------------------------------------------------------------
# Output projection: y = x @ w + b, (M, N)-tiled like the QKV projection.
# -----------------------------------------------------------------------------
def _linear_kernel(x_ref, w_ref, b_ref, o_ref):
    o_ref[...] = (jnp.dot(x_ref[...], w_ref[...],
                          preferred_element_type=jnp.float32)
                  + b_ref[...]).astype(o_ref.dtype)


def linear(x, w, b2d):
    """x: (M, E_in), w: (E_in, E_out), b2d: (1, E_out) -> (M, E_out)."""
    M, E_in = x.shape
    E_out = w.shape[1]
    itemsize = x.dtype.itemsize
    budget = _vmem_budget_bytes()
    tn = _pick_col_tile(E_in, E_out, itemsize, n_mats=1, budget=budget // 2)
    tm = _pick_row_tile(M, (E_in + tn) * itemsize, budget=budget // 2)
    est = 2 * itemsize * (tm * E_in + E_in * tn + tn + tm * tn)
    return pl.pallas_call(
        _linear_kernel,
        out_shape=jax.ShapeDtypeStruct((M, E_out), x.dtype),
        grid_spec=pltpu.PrefetchScalarGridSpec(
            num_scalar_prefetch=0,
            grid=(pl.cdiv(M, tm), pl.cdiv(E_out, tn)),
            in_specs=[
                pl.BlockSpec((tm, E_in), lambda i, j: (i, 0)),     # revisited over j
                pl.BlockSpec((E_in, tn), lambda i, j: (0, j)),     # streamed columns
                pl.BlockSpec((1, tn), lambda i, j: (0, j)),
            ],
            out_specs=pl.BlockSpec((tm, tn), lambda i, j: (i, j)),
        ),
        compiler_params=pltpu.CompilerParams(
            dimension_semantics=("parallel", "parallel"),
            vmem_limit_bytes=_vmem_limit(est)),
    )(x, w, b2d)


# -----------------------------------------------------------------------------
# Flash-style attention: grid (batch, head-group, kv-tile["arbitrary"]).
# q/k/v/out stay in (B, T, E) layout (head h on lane slice [h*hd,(h+1)*hd)),
# so no HBM transposes. Online softmax keeps max/denominator/accumulator in
# f32 VMEM scratch across the KV axis; the scaling is pre-folded into Wq.
# -----------------------------------------------------------------------------
def _attn_kernel(q_ref, k_ref, v_ref, o_ref, m_sc, l_sc, acc_sc, *,
                 heads_per_block, head_dim):
    kv = pl.program_id(2)

    @pl.when(kv == 0)
    def _init():
        m_sc[...] = jnp.full(m_sc.shape, -jnp.inf, m_sc.dtype)
        l_sc[...] = jnp.zeros(l_sc.shape, l_sc.dtype)
        acc_sc[...] = jnp.zeros(acc_sc.shape, acc_sc.dtype)

    qb = q_ref[0]                         # (T,  hw)
    kb = k_ref[0]                         # (ts, hw)
    vb = v_ref[0]                         # (ts, hw)

    for h in range(heads_per_block):      # static unroll over the head group
        lo = h * head_dim
        hi = lo + head_dim
        q = qb[:, lo:hi]                  # (T,  hd)  (scaling already folded in)
        k = kb[:, lo:hi]                  # (ts, hd)
        v = vb[:, lo:hi]                  # (ts, hd)
        # Contract last dims of q and k directly -> no in-kernel transpose.
        s = lax.dot_general(q, k, (((1,), (1,)), ((), ())),
                            preferred_element_type=jnp.float32)    # (T, ts) f32
        m_prev = m_sc[:, h:h + 1]                                  # (T, 1)
        l_prev = l_sc[:, h:h + 1]
        m_new = jnp.maximum(m_prev, jnp.max(s, axis=-1, keepdims=True))
        alpha = jnp.exp(m_prev - m_new)                            # (T, 1)
        p = jnp.exp(s - m_new)                                     # (T, ts)
        l_sc[:, h:h + 1] = alpha * l_prev + jnp.sum(p, axis=-1, keepdims=True)
        pv = jnp.dot(p.astype(v.dtype), v,
                     preferred_element_type=jnp.float32)           # (T, hd)
        acc_sc[:, lo:hi] = alpha * acc_sc[:, lo:hi] + pv           # direct accumulate
        m_sc[:, h:h + 1] = m_new

    @pl.when(kv == pl.num_programs(2) - 1)
    def _finalize():
        for h in range(heads_per_block):
            lo = h * head_dim
            hi = lo + head_dim
            inv = pl.reciprocal(l_sc[:, h:h + 1], approx=True)     # EUP
            acc_sc[:, lo:hi] = acc_sc[:, lo:hi] * inv
        o_ref[0] = acc_sc[...].astype(o_ref.dtype)                 # lane-dense store


def attention(q, k, v, num_heads, *, kv_block_size=None):
    """q: (B, T, E), k/v: (B, S, E) -> (B, T, E); heads on lane slices of E."""
    B, T, E = q.shape
    S = k.shape[1]
    hd = E // num_heads
    hb = _pick_heads_per_block(num_heads, hd)
    hw = hb * hd
    ts = kv_block_size if kv_block_size is not None else _pick_kv_tile(S)
    assert S % ts == 0 and (ts % 8 == 0 or ts == S), (S, ts)
    itemsize = q.dtype.itemsize
    est = (2 * itemsize * (2 * T * hw + 2 * ts * hw)               # q/out + k/v blocks
           + 4 * (T * hw + 2 * T * max(hb, 128) + 2 * T * ts))     # scratch + live scores
    kern = functools.partial(_attn_kernel, heads_per_block=hb, head_dim=hd)
    return pl.pallas_call(
        kern,
        out_shape=jax.ShapeDtypeStruct((B, T, E), q.dtype),
        grid_spec=pltpu.PrefetchScalarGridSpec(
            num_scalar_prefetch=0,
            grid=(B, num_heads // hb, S // ts),
            in_specs=[
                pl.BlockSpec((1, T, hw), lambda b, j, s: (b, 0, j)),
                pl.BlockSpec((1, ts, hw), lambda b, j, s: (b, s, j)),
                pl.BlockSpec((1, ts, hw), lambda b, j, s: (b, s, j)),
            ],
            out_specs=pl.BlockSpec((1, T, hw), lambda b, j, s: (b, 0, j)),
            scratch_shapes=[
                pltpu.VMEM((T, hb), jnp.float32),    # running max per head
                pltpu.VMEM((T, hb), jnp.float32),    # running denominator per head
                pltpu.VMEM((T, hw), jnp.float32),    # f32 output accumulator
            ],
        ),
        compiler_params=pltpu.CompilerParams(
            dimension_semantics=("parallel", "parallel", "arbitrary"),
            vmem_limit_bytes=_vmem_limit(est)),
    )(q, k, v)


# -----------------------------------------------------------------------------
# Full module forward (self-attention path)
# -----------------------------------------------------------------------------
def gptsan_attention_forward(hidden_states, prepared, num_heads, *,
                             kv_block_size=None):
    """hidden_states: (B, T, E); prepared = prepare_params(...). -> (B, T, E)."""
    B, T, E = hidden_states.shape
    x2d = hidden_states.reshape(B * T, E)

    q, k, v = qkv_proj(x2d, prepared["w_qkv"], prepared["b_qkv"])   # each (B*T, E)

    # (B*T, E) -> (B, T, E) is a free metadata reshape; head h already lives on
    # lane slice [h*hd:(h+1)*hd], so no transposes through HBM.
    attn = attention(q.reshape(B, T, E), k.reshape(B, T, E),
                     v.reshape(B, T, E), num_heads,
                     kv_block_size=kv_block_size)                    # (B, T, E)

    out = linear(attn.reshape(B * T, E), prepared["o_w"], prepared["o_b"])
    return out.reshape(B, T, E)
    # TODO(synk): cross-attention / past_key_value / attention_mask /
    # layer_head_mask / output_attentions / dropout branches not exercised.


# -----------------------------------------------------------------------------
# Pure-JAX reference (mirrors the PyTorch forward exactly) for verification.
# -----------------------------------------------------------------------------
def reference_forward(hidden_states, params, num_heads):
    B, T, E = hidden_states.shape
    hd = E // num_heads
    scaling = hd ** (-0.5)
    x = hidden_states.reshape(B * T, E)
    q = (x @ params["q_w"] + params["q_b"]) * scaling
    k = x @ params["k_w"] + params["k_b"]
    v = x @ params["v_w"] + params["v_b"]

    def shp(t):
        return t.reshape(B, T, num_heads, hd).transpose(0, 2, 1, 3).reshape(
            B * num_heads, T, hd)

    q, k, v = shp(q), shp(k), shp(v)
    w = jnp.einsum("bqd,bkd->bqk", q, k)
    w = jax.nn.softmax(w, axis=-1)
    o = jnp.einsum("bqk,bkd->bqd", w, v)
    o = o.reshape(B, num_heads, T, hd).transpose(0, 2, 1, 3).reshape(B * T, E)
    o = o @ params["o_w"] + params["o_b"]
    return o.reshape(B, T, E)


if __name__ == "__main__":
    B, T, E, H = 2, 16, 32, 4

    key = jax.random.PRNGKey(0)
    keys = jax.random.split(key, 9)
    scale = 0.02
    # Weights stored as (in, out), i.e. PyTorch nn.Linear weight transposed.
    raw = {
        "q_w": scale * jax.random.normal(keys[0], (E, E), jnp.float32),
        "q_b": scale * jax.random.normal(keys[1], (E,), jnp.float32),
        "k_w": scale * jax.random.normal(keys[2], (E, E), jnp.float32),
        "k_b": scale * jax.random.normal(keys[3], (E,), jnp.float32),
        "v_w": scale * jax.random.normal(keys[4], (E, E), jnp.float32),
        "v_b": scale * jax.random.normal(keys[5], (E,), jnp.float32),
        "o_w": scale * jax.random.normal(keys[6], (E, E), jnp.float32),
        "o_b": scale * jax.random.normal(keys[7], (E,), jnp.float32),
    }
    hidden_states = jax.random.normal(keys[8], (B, T, E), jnp.float32)
    ref = reference_forward(hidden_states, raw, H)

    # kv_block_size=8 forces 2 online-softmax KV steps so the flash path is
    # genuinely exercised even at this small sequence length.
    fwd = jax.jit(functools.partial(gptsan_attention_forward, num_heads=H,
                                    kv_block_size=8))

    # f32 path: tight check (approx reciprocal changes low-order bits -> 1e-4).
    prepared_f32 = prepare_params(raw, H, dtype=jnp.float32)
    out = jax.block_until_ready(fwd(hidden_states, prepared_f32))
    assert out.shape == (B, T, E)
    assert jnp.allclose(out, ref, atol=1e-4, rtol=1e-4), (
        float(jnp.max(jnp.abs(out - ref))))

    # bf16 operands / f32 accumulation path: looser check.
    prepared_bf16 = prepare_params(raw, H, dtype=jnp.bfloat16)
    out_bf16 = jax.block_until_ready(
        fwd(hidden_states.astype(jnp.bfloat16), prepared_bf16))
    out_bf16 = out_bf16.astype(jnp.float32)
    assert jnp.allclose(out_bf16, ref, atol=2e-2, rtol=2e-2), (
        float(jnp.max(jnp.abs(out_bf16 - ref))))

    print("KERNEL_OK")
</pallas_src>

<mosaic_0001>
module attributes {stable_mosaic.version = 11 : i64} {
  func.func @_linear_kernel(%arg0: i32, %arg1: i32, %arg2: memref<32x32xf32, #tpu.memory_space<vmem>>, %arg3: memref<32x32xf32, #tpu.memory_space<vmem>>, %arg4: memref<1x32xf32, #tpu.memory_space<vmem>>, %arg5: memref<32x32xf32, #tpu.memory_space<vmem>>) attributes {dimension_semantics = [#tpu.dimension_semantics<parallel>, #tpu.dimension_semantics<parallel>], iteration_bounds = array<i64: 1, 1>, scalar_prefetch = 0 : i64, scratch_operands = 0 : i64, tpu.core_type = #tpu.core_type<tc>, window_params = [{transform_indices = @transform_0, window_bounds = array<i64: 32, 32>}, {transform_indices = @transform_1, window_bounds = array<i64: 32, 32>}, {transform_indices = @transform_2, window_bounds = array<i64: 1, 32>}, {transform_indices = @transform_3, window_bounds = array<i64: 32, 32>}]} {
    %c0 = arith.constant 0 : index
    %c0_0 = arith.constant 0 : index
    %0 = vector.load %arg2[%c0, %c0_0] : memref<32x32xf32, #tpu.memory_space<vmem>>, vector<32x32xf32>
    %c0_1 = arith.constant 0 : index
    %c0_2 = arith.constant 0 : index
    %1 = vector.load %arg3[%c0_1, %c0_2] : memref<32x32xf32, #tpu.memory_space<vmem>>, vector<32x32xf32>
    %cst = arith.constant dense<0.000000e+00> : vector<32x32xf32>
    %2 = tpu.matmul %0, %1, %cst {dimension_numbers = #tpu.dot_dimension_numbers<[1], [0], [0], [1], [0, 0, 1, 1], [], []>} : vector<32x32xf32>, vector<32x32xf32>, vector<32x32xf32> -> vector<32x32xf32>
    %c0_3 = arith.constant 0 : index
    %c0_4 = arith.constant 0 : index
    %3 = vector.load %arg4[%c0_3, %c0_4] : memref<1x32xf32, #tpu.memory_space<vmem>>, vector<1x32xf32>
    %4 = vector.broadcast %3 : vector<1x32xf32> to vector<32x32xf32>
    %5 = arith.addf %2, %4 : vector<32x32xf32>
    %c0_5 = arith.constant 0 : index
    %c0_6 = arith.constant 0 : index
    %6 = vector.load %arg5[%c0_5, %c0_6] : memref<32x32xf32, #tpu.memory_space<vmem>>, vector<32x32xf32>
    tpu.vector_store %arg5[%c0_5, %c0_6], %5 {strides = array<i32>} : memref<32x32xf32, #tpu.memory_space<vmem>>, vector<32x32xf32>,
    return
  }
  func.func @transform_0(%arg0: i32, %arg1: i32) -> (i32, i32) {
    %c0_i32 = arith.constant 0 : i32
    %c0_i32_0 = arith.constant 0 : i32
    return %arg0, %c0_i32 : i32, i32
  }
  func.func @transform_1(%arg0: i32, %arg1: i32) -> (i32, i32) {
    %c0_i32 = arith.constant 0 : i32
    %c0_i32_0 = arith.constant 0 : i32
    return %c0_i32, %arg1 : i32, i32
  }
  func.func @transform_2(%arg0: i32, %arg1: i32) -> (i32, i32) {
    %c0_i32 = arith.constant 0 : i32
    %c0_i32_0 = arith.constant 0 : i32
    return %c0_i32, %arg1 : i32, i32
  }
  func.func @transform_3(%arg0: i32, %arg1: i32) -> (i32, i32) {
    %c0_i32 = arith.constant 0 : i32
    return %arg0, %arg1 : i32, i32
  }
}

module attributes {stable_mosaic.version = 11 : i64} {
  func.func @_qkv_kernel(%arg0: i32, %arg1: i32, %arg2: memref<32x32xf32, #tpu.memory_space<vmem>>, %arg3: memref<3x32x32xf32, #tpu.memory_space<vmem>>, %arg4: memref<3x1x32xf32, #tpu.memory_space<vmem>>, %arg5: memref<32x32xf32, #tpu.memory_space<vmem>>, %arg6: memref<32x32xf32, #tpu.memory_space<vmem>>, %arg7: memref<32x32xf32, #tpu.memory_space<vmem>>) attributes {dimension_semantics = [#tpu.dimension_semantics<parallel>, #tpu.dimension_semantics<parallel>], iteration_bounds = array<i64: 1, 1>, scalar_prefetch = 0 : i64, scratch_operands = 0 : i64, tpu.core_type = #tpu.core_type<tc>, window_params = [{transform_indices = @transform_0, window_bounds = array<i64: 32, 32>}, {transform_indices = @transform_1, window_bounds = array<i64: 3, 32, 32>}, {transform_indices = @transform_2, window_bounds = array<i64: 3, 1, 32>}, {transform_indices = @transform_3, window_bounds = array<i64: 32, 32>}, {transform_indices = @transform_4, window_bounds = array<i64: 32, 32>}, {transform_indices = @transform_5, window_bounds = array<i64: 32, 32>}]} {
    %c0 = arith.constant 0 : index
    %c0_0 = arith.constant 0 : index
    %0 = vector.load %arg2[%c0, %c0_0] : memref<32x32xf32, #tpu.memory_space<vmem>>, vector<32x32xf32>
    %c0_1 = arith.constant 0 : index
    %c0_2 = arith.constant 0 : index
    %c0_3 = arith.constant 0 : index
    %1 = vector.load %arg3[%c0_1, %c0_2, %c0_3] : memref<3x32x32xf32, #tpu.memory_space<vmem>>, vector<1x32x32xf32>
    %2 = vector.shape_cast %1 : vector<1x32x32xf32> to vector<32x32xf32>
    %cst = arith.constant dense<0.000000e+00> : vector<32x32xf32>
    %3 = tpu.matmul %0, %2, %cst {dimension_numbers = #tpu.dot_dimension_numbers<[1], [0], [0], [1], [0, 0, 1, 1], [], []>} : vector<32x32xf32>, vector<32x32xf32>, vector<32x32xf32> -> vector<32x32xf32>
    %c0_4 = arith.constant 0 : index
    %c0_5 = arith.constant 0 : index
    %c0_6 = arith.constant 0 : index
    %4 = vector.load %arg4[%c0_4, %c0_5, %c0_6] : memref<3x1x32xf32, #tpu.memory_space<vmem>>, vector<1x1x32xf32>
    %5 = vector.shape_cast %4 : vector<1x1x32xf32> to vector<1x32xf32>
    %6 = vector.broadcast %5 : vector<1x32xf32> to vector<32x32xf32>
    %7 = arith.addf %3, %6 : vector<32x32xf32>
    %c0_7 = arith.constant 0 : index
    %c0_8 = arith.constant 0 : index
    %8 = vector.load %arg5[%c0_7, %c0_8] : memref<32x32xf32, #tpu.memory_space<vmem>>, vector<32x32xf32>
    tpu.vector_store %arg5[%c0_7, %c0_8], %7 {strides = array<i32>} : memref<32x32xf32, #tpu.memory_space<vmem>>, vector<32x32xf32>,
    %c1 = arith.constant 1 : index
    %c0_9 = arith.constant 0 : index
    %c0_10 = arith.constant 0 : index
    %9 = vector.load %arg3[%c1, %c0_9, %c0_10] : memref<3x32x32xf32, #tpu.memory_space<vmem>>, vector<1x32x32xf32>
    %10 = vector.shape_cast %9 : vector<1x32x32xf32> to vector<32x32xf32>
    %cst_11 = arith.constant dense<0.000000e+00> : vector<32x32xf32>
    %11 = tpu.matmul %0, %10, %cst_11 {dimension_numbers = #tpu.dot_dimension_numbers<[1], [0], [0], [1], [0, 0, 1, 1], [], []>} : vector<32x32xf32>, vector<32x32xf32>, vector<32x32xf32> -> vector<32x32xf32>
    %c1_12 = arith.constant 1 : index
    %c0_13 = arith.constant 0 : index
    %c0_14 = arith.constant 0 : index
    %12 = vector.load %arg4[%c1_12, %c0_13, %c0_14] : memref<3x1x32xf32, #tpu.memory_space<vmem>>, vector<1x1x32xf32>
    %13 = vector.shape_cast %12 : vector<1x1x32xf32> to vector<1x32xf32>
    %14 = vector.broadcast %13 : vector<1x32xf32> to vector<32x32xf32>
    %15 = arith.addf %11, %14 : vector<32x32xf32>
    %c0_15 = arith.constant 0 : index
    %c0_16 = arith.constant 0 : index
    %16 = vector.load %arg6[%c0_15, %c0_16] : memref<32x32xf32, #tpu.memory_space<vmem>>, vector<32x32xf32>
    tpu.vector_store %arg6[%c0_15, %c0_16], %15 {strides = array<i32>} : memref<32x32xf32, #tpu.memory_space<vmem>>, vector<32x32xf32>,
    %c2 = arith.constant 2 : index
    %c0_17 = arith.constant 0 : index
    %c0_18 = arith.constant 0 : index
    %17 = vector.load %arg3[%c2, %c0_17, %c0_18] : memref<3x32x32xf32, #tpu.memory_space<vmem>>, vector<1x32x32xf32>
    %18 = vector.shape_cast %17 : vector<1x32x32xf32> to vector<32x32xf32>
    %cst_19 = arith.constant dense<0.000000e+00> : vector<32x32xf32>
    %19 = tpu.matmul %0, %18, %cst_19 {dimension_numbers = #tpu.dot_dimension_numbers<[1], [0], [0], [1], [0, 0, 1, 1], [], []>} : vector<32x32xf32>, vector<32x32xf32>, vector<32x32xf32> -> vector<32x32xf32>
    %c2_20 = arith.constant 2 : index
    %c0_21 = arith.constant 0 : index
    %c0_22 = arith.constant 0 : index
    %20 = vector.load %arg4[%c2_20, %c0_21, %c0_22] : memref<3x1x32xf32, #tpu.memory_space<vmem>>, vector<1x1x32xf32>
    %21 = vector.shape_cast %20 : vector<1x1x32xf32> to vector<1x32xf32>
    %22 = vector.broadcast %21 : vector<1x32xf32> to vector<32x32xf32>
    %23 = arith.addf %19, %22 : vector<32x32xf32>
    %c0_23 = arith.constant 0 : index
    %c0_24 = arith.constant 0 : index
    %24 = vector.load %arg7[%c0_23, %c0_24] : memref<32x32xf32, #tpu.memory_space<vmem>>, vector<32x32xf32>
    tpu.vector_store %arg7[%c0_23, %c0_24], %23 {strides = array<i32>} : memref<32x32xf32, #tpu.memory_space<vmem>>, vector<32x32xf32>,
    return
  }
  func.func @transform_0(%arg0: i32, %arg1: i32) -> (i32, i32) {
    %c0_i32 = arith.constant 0 : i32
    %c0_i32_0 = arith.constant 0 : i32
    return %arg0, %c0_i32 : i32, i32
  }
  func.func @transform_1(%arg0: i32, %arg1: i32) -> (i32, i32, i32) {
    %c0_i32 = arith.constant 0 : i32
    %c0_i32_0 = arith.constant 0 : i32
    %c0_i32_1 = arith.constant 0 : i32
    return %c0_i32, %c0_i32_0, %arg1 : i32, i32, i32
  }
  func.func @transform_2(%arg0: i32, %arg1: i32) -> (i32, i32, i32) {
    %c0_i32 = arith.constant 0 : i32
    %c0_i32_0 = arith.constant 0 : i32
    %c0_i32_1 = arith.constant 0 : i32
    return %c0_i32, %c0_i32_0, %arg1 : i32, i32, i32
  }
  func.func @transform_3(%arg0: i32, %arg1: i32) -> (i32, i32) {
    %c0_i32 = arith.constant 0 : i32
    return %arg0, %arg1 : i32, i32
  }
  func.func @transform_4(%arg0: i32, %arg1: i32) -> (i32, i32) {
    %c0_i32 = arith.constant 0 : i32
    return %arg0, %arg1 : i32, i32
  }
  func.func @transform_5(%arg0: i32, %arg1: i32) -> (i32, i32) {
    %c0_i32 = arith.constant 0 : i32
    return %arg0, %arg1 : i32, i32
  }
}

module attributes {stable_mosaic.version = 11 : i64} {
  func.func @_attn_kernel(%arg0: i32, %arg1: i32, %arg2: i32, %arg3: memref<1x16x32xf32, #tpu.memory_space<vmem>>, %arg4: memref<1x8x32xf32, #tpu.memory_space<vmem>>, %arg5: memref<1x8x32xf32, #tpu.memory_space<vmem>>, %arg6: memref<1x16x32xf32, #tpu.memory_space<vmem>>, %arg7: memref<16x4xf32, #tpu.memory_space<vmem>>, %arg8: memref<16x4xf32, #tpu.memory_space<vmem>>, %arg9: memref<16x32xf32, #tpu.memory_space<vmem>>) attributes {dimension_semantics = [#tpu.dimension_semantics<parallel>, #tpu.dimension_semantics<parallel>, #tpu.dimension_semantics<arbitrary>], iteration_bounds = array<i64: 2, 1, 2>, scalar_prefetch = 0 : i64, scratch_operands = 3 : i64, tpu.core_type = #tpu.core_type<tc>, window_params = [{transform_indices = @transform_0, window_bounds = array<i64: 1, 16, 32>}, {transform_indices = @transform_1, window_bounds = array<i64: 1, 8, 32>}, {transform_indices = @transform_2, window_bounds = array<i64: 1, 8, 32>}, {transform_indices = @transform_3, window_bounds = array<i64: 1, 16, 32>}]} {
    %c0_i32 = arith.constant 0 : i32
    %0 = arith.cmpi eq, %arg2, %c0_i32 : i32
    %1 = arith.extui %0 : i1 to i32
    %c0_i32_0 = arith.constant 0 : i32
    %2 = arith.cmpi ne, %1, %c0_i32_0 : i32
    scf.if %2 {
      %cst_67 = arith.constant 0xFF800000 : f32
      %116 = vector.broadcast %cst_67 : f32 to vector<16x4xf32>
      %c0_68 = arith.constant 0 : index
      %c0_69 = arith.constant 0 : index
      %117 = vector.load %arg7[%c0_68, %c0_69] : memref<16x4xf32, #tpu.memory_space<vmem>>, vector<16x4xf32>
      tpu.vector_store %arg7[%c0_68, %c0_69], %116 {strides = array<i32>} : memref<16x4xf32, #tpu.memory_space<vmem>>, vector<16x4xf32>,
      %cst_70 = arith.constant 0.000000e+00 : f32
      %118 = vector.broadcast %cst_70 : f32 to vector<16x4xf32>
      %c0_71 = arith.constant 0 : index
      %c0_72 = arith.constant 0 : index
      %119 = vector.load %arg8[%c0_71, %c0_72] : memref<16x4xf32, #tpu.memory_space<vmem>>, vector<16x4xf32>
      tpu.vector_store %arg8[%c0_71, %c0_72], %118 {strides = array<i32>} : memref<16x4xf32, #tpu.memory_space<vmem>>, vector<16x4xf32>,
      %cst_73 = arith.constant 0.000000e+00 : f32
      %120 = vector.broadcast %cst_73 : f32 to vector<16x32xf32>
      %c0_74 = arith.constant 0 : index
      %c0_75 = arith.constant 0 : index
      %121 = vector.load %arg9[%c0_74, %c0_75] : memref<16x32xf32, #tpu.memory_space<vmem>>, vector<16x32xf32>
      tpu.vector_store %arg9[%c0_74, %c0_75], %120 {strides = array<i32>} : memref<16x32xf32, #tpu.memory_space<vmem>>, vector<16x32xf32>,
    } else {
    }
    %c0 = arith.constant 0 : index
    %c0_1 = arith.constant 0 : index
    %c0_2 = arith.constant 0 : index
    %3 = vector.load %arg3[%c0, %c0_1, %c0_2] : memref<1x16x32xf32, #tpu.memory_space<vmem>>, vector<1x16x32xf32>
    %4 = vector.shape_cast %3 : vector<1x16x32xf32> to vector<16x32xf32>
    %c0_3 = arith.constant 0 : index
    %c0_4 = arith.constant 0 : index
    %c0_5 = arith.constant 0 : index
    %5 = vector.load %arg4[%c0_3, %c0_4, %c0_5] : memref<1x8x32xf32, #tpu.memory_space<vmem>>, vector<1x8x32xf32>
    %6 = vector.shape_cast %5 : vector<1x8x32xf32> to vector<8x32xf32>
    %c0_6 = arith.constant 0 : index
    %c0_7 = arith.constant 0 : index
    %c0_8 = arith.constant 0 : index
    %7 = vector.load %arg5[%c0_6, %c0_7, %c0_8] : memref<1x8x32xf32, #tpu.memory_space<vmem>>, vector<1x8x32xf32>
    %8 = vector.shape_cast %7 : vector<1x8x32xf32> to vector<8x32xf32>
    %9 = vector.extract_strided_slice %4 {offsets = [0, 0], sizes = [16, 8], strides = [1, 1]} : vector<16x32xf32> to vector<16x8xf32>
    %10 = vector.extract_strided_slice %6 {offsets = [0, 0], sizes = [8, 8], strides = [1, 1]} : vector<8x32xf32> to vector<8x8xf32>
    %11 = vector.extract_strided_slice %8 {offsets = [0, 0], sizes = [8, 8], strides = [1, 1]} : vector<8x32xf32> to vector<8x8xf32>
    %cst = arith.constant dense<0.000000e+00> : vector<16x8xf32>
    %12 = tpu.matmul %9, %10, %cst {dimension_numbers = #tpu.dot_dimension_numbers<[1], [1], [0], [0], [0, 0, 1, 0], [], []>} : vector<16x8xf32>, vector<8x8xf32>, vector<16x8xf32> -> vector<16x8xf32>
    %c0_9 = arith.constant 0 : index
    %c0_10 = arith.constant 0 : index
    %13 = vector.load %arg7[%c0_9, %c0_10] : memref<16x4xf32, #tpu.memory_space<vmem>>, vector<16x1xf32>
    %c0_11 = arith.constant 0 : index
    %c0_12 = arith.constant 0 : index
    %14 = vector.load %arg8[%c0_11, %c0_12] : memref<16x4xf32, #tpu.memory_space<vmem>>, vector<16x1xf32>
    %cst_13 = arith.constant dense<0xFF800000> : vector<16xf32>
    %15 = vector.multi_reduction <maximumf>, %12, %cst_13 [1] : vector<16x8xf32> to vector<16xf32>
    %16 = vector.shape_cast %15 : vector<16xf32> to vector<16x1xf32>
    %17 = arith.maximumf %13, %16 : vector<16x1xf32>
    %18 = arith.subf %13, %17 : vector<16x1xf32>
    %19 = math.exp %18 : vector<16x1xf32>
    %20 = vector.broadcast %17 : vector<16x1xf32> to vector<16x8xf32>
    %21 = arith.subf %12, %20 : vector<16x8xf32>
    %22 = math.exp %21 : vector<16x8xf32>
    %23 = arith.mulf %19, %14 : vector<16x1xf32>
    %cst_14 = arith.constant dense<0.000000e+00> : vector<16xf32>
    %24 = vector.multi_reduction <add>, %22, %cst_14 [1] : vector<16x8xf32> to vector<16xf32>
    %25 = vector.shape_cast %24 : vector<16xf32> to vector<16x1xf32>
    %26 = arith.addf %23, %25 : vector<16x1xf32>
    %c0_15 = arith.constant 0 : index
    %c0_16 = arith.constant 0 : index
    %27 = vector.load %arg8[%c0_15, %c0_16] : memref<16x4xf32, #tpu.memory_space<vmem>>, vector<16x1xf32>
    tpu.vector_store %arg8[%c0_15, %c0_16], %26 {strides = array<i32>} : memref<16x4xf32, #tpu.memory_space<vmem>>, vector<16x1xf32>,
    %cst_17 = arith.constant dense<0.000000e+00> : vector<16x8xf32>
    %28 = tpu.matmul %22, %11, %cst_17 {dimension_numbers = #tpu.dot_dimension_numbers<[1], [0], [0], [1], [0, 0, 1, 1], [], []>} : vector<16x8xf32>, vector<8x8xf32>, vector<16x8xf32> -> vector<16x8xf32>
    %c0_18 = arith.constant 0 : index
    %c0_19 = arith.constant 0 : index
    %29 = vector.load %arg9[%c0_18, %c0_19] : memref<16x32xf32, #tpu.memory_space<vmem>>, vector<16x8xf32>
    %30 = vector.broadcast %19 : vector<16x1xf32> to vector<16x8xf32>
    %31 = arith.mulf %30, %29 : vector<16x8xf32>
    %32 = arith.addf %31, %28 : vector<16x8xf32>
    %c0_20 = arith.constant 0 : index
    %c0_21 = arith.constant 0 : index
    %33 = vector.load %arg9[%c0_20, %c0_21] : memref<16x32xf32, #tpu.memory_space<vmem>>, vector<16x8xf32>
    tpu.vector_store %arg9[%c0_20, %c0_21], %32 {strides = array<i32>} : memref<16x32xf32, #tpu.memory_space<vmem>>, vector<16x8xf32>,
    %c0_22 = arith.constant 0 : index
    %c0_23 = arith.constant 0 : index
    %34 = vector.load %arg7[%c0_22, %c0_23] : memref<16x4xf32, #tpu.memory_space<vmem>>, vector<16x1xf32>
    tpu.vector_store %arg7[%c0_22, %c0_23], %17 {strides = array<i32>} : memref<16x4xf32, #tpu.memory_space<vmem>>, vector<16x1xf32>,
    %35 = vector.extract_strided_slice %4 {offsets = [0, 8], sizes = [16, 8], strides = [1, 1]} : vector<16x32xf32> to vector<16x8xf32>
    %36 = vector.extract_strided_slice %6 {offsets = [0, 8], sizes = [8, 8], strides = [1, 1]} : vector<8x32xf32> to vector<8x8xf32>
    %37 = vector.extract_strided_slice %8 {offsets = [0, 8], sizes = [8, 8], strides = [1, 1]} : vector<8x32xf32> to vector<8x8xf32>
    %cst_24 = arith.constant dense<0.000000e+00> : vector<16x8xf32>
    %38 = tpu.matmul %35, %36, %cst_24 {dimension_numbers = #tpu.dot_dimension_numbers<[1], [1], [0], [0], [0, 0, 1, 0], [], []>} : vector<16x8xf32>, vector<8x8xf32>, vector<16x8xf32> -> vector<16x8xf32>
    %c0_25 = arith.constant 0 : index
    %c1 = arith.constant 1 : index
    %39 = vector.load %arg7[%c0_25, %c1] : memref<16x4xf32, #tpu.memory_space<vmem>>, vector<16x1xf32>
    %c0_26 = arith.constant 0 : index
    %c1_27 = arith.constant 1 : index
    %40 = vector.load %arg8[%c0_26, %c1_27] : memref<16x4xf32, #tpu.memory_space<vmem>>, vector<16x1xf32>
    %cst_28 = arith.constant dense<0xFF800000> : vector<16xf32>
    %41 = vector.multi_reduction <maximumf>, %38, %cst_28 [1] : vector<16x8xf32> to vector<16xf32>
    %42 = vector.shape_cast %41 : vector<16xf32> to vector<16x1xf32>
    %43 = arith.maximumf %39, %42 : vector<16x1xf32>
    %44 = arith.subf %39, %43 : vector<16x1xf32>
    %45 = math.exp %44 : vector<16x1xf32>
    %46 = vector.broadcast %43 : vector<16x1xf32> to vector<16x8xf32>
    %47 = arith.subf %38, %46 : vector<16x8xf32>
    %48 = math.exp %47 : vector<16x8xf32>
    %49 = arith.mulf %45, %40 : vector<16x1xf32>
    %cst_29 = arith.constant dense<0.000000e+00> : vector<16xf32>
    %50 = vector.multi_reduction <add>, %48, %cst_29 [1] : vector<16x8xf32> to vector<16xf32>
    %51 = vector.shape_cast %50 : vector<16xf32> to vector<16x1xf32>
    %52 = arith.addf %49, %51 : vector<16x1xf32>
    %c0_30 = arith.constant 0 : index
    %c1_31 = arith.constant 1 : index
    %53 = vector.load %arg8[%c0_30, %c1_31] : memref<16x4xf32, #tpu.memory_space<vmem>>, vector<16x1xf32>
    tpu.vector_store %arg8[%c0_30, %c1_31], %52 {strides = array<i32>} : memref<16x4xf32, #tpu.memory_space<vmem>>, vector<16x1xf32>,
    %cst_32 = arith.constant dense<0.000000e+00> : vector<16x8xf32>
    %54 = tpu.matmul %48, %37, %cst_32 {dimension_numbers = #tpu.dot_dimension_numbers<[1], [0], [0], [1], [0, 0, 1, 1], [], []>} : vector<16x8xf32>, vector<8x8xf32>, vector<16x8xf32> -> vector<16x8xf32>
    %c0_33 = arith.constant 0 : index
    %c8 = arith.constant 8 : index
    %55 = vector.load %arg9[%c0_33, %c8] : memref<16x32xf32, #tpu.memory_space<vmem>>, vector<16x8xf32>
    %56 = vector.broadcast %45 : vector<16x1xf32> to vector<16x8xf32>
    %57 = arith.mulf %56, %55 : vector<16x8xf32>
    %58 = arith.addf %57, %54 : vector<16x8xf32>
    %c0_34 = arith.constant 0 : index
    %c8_35 = arith.constant 8 : index
    %59 = vector.load %arg9[%c0_34, %c8_35] : memref<16x32xf32, #tpu.memory_space<vmem>>, vector<16x8xf32>
    tpu.vector_store %arg9[%c0_34, %c8_35], %58 {strides = array<i32>} : memref<16x32xf32, #tpu.memory_space<vmem>>, vector<16x8xf32>,
    %c0_36 = arith.constant 0 : index
    %c1_37 = arith.constant 1 : index
    %60 = vector.load %arg7[%c0_36, %c1_37] : memref<16x4xf32, #tpu.memory_space<vmem>>, vector<16x1xf32>
    tpu.vector_store %arg7[%c0_36, %c1_37], %43 {strides = array<i32>} : memref<16x4xf32, #tpu.memory_space<vmem>>, vector<16x1xf32>,
    %61 = vector.extract_strided_slice %4 {offsets = [0, 16], sizes = [16, 8], strides = [1, 1]} : vector<16x32xf32> to vector<16x8xf32>
    %62 = vector.extract_strided_slice %6 {offsets = [0, 16], sizes = [8, 8], strides = [1, 1]} : vector<8x32xf32> to vector<8x8xf32>
    %63 = vector.extract_strided_slice %8 {offsets = [0, 16], sizes = [8, 8], strides = [1, 1]} : vector<8x32xf32> to vector<8x8xf32>
    %cst_38 = arith.constant dense<0.000000e+00> : vector<16x8xf32>
    %64 = tpu.matmul %61, %62, %cst_38 {dimension_numbers = #tpu.dot_dimension_numbers<[1], [1], [0], [0], [0, 0, 1, 0], [], []>} : vector<16x8xf32>, vector<8x8xf32>, vector<16x8xf32> -> vector<16x8xf32>
    %c0_39 = arith.constant 0 : index
    %c2 = arith.constant 2 : index
    %65 = vector.load %arg7[%c0_39, %c2] : memref<16x4xf32, #tpu.memory_space<vmem>>, vector<16x1xf32>
    %c0_40 = arith.constant 0 : index
    %c2_41 = arith.constant 2 : index
    %66 = vector.load %arg8[%c0_40, %c2_41] : memref<16x4xf32, #tpu.memory_space<vmem>>, vector<16x1xf32>
    %cst_42 = arith.constant dense<0xFF800000> : vector<16xf32>
    %67 = vector.multi_reduction <maximumf>, %64, %cst_42 [1] : vector<16x8xf32> to vector<16xf32>
    %68 = vector.shape_cast %67 : vector<16xf32> to vector<16x1xf32>
    %69 = arith.maximumf %65, %68 : vector<16x1xf32>
    %70 = arith.subf %65, %69 : vector<16x1xf32>
    %71 = math.exp %70 : vector<16x1xf32>
    %72 = vector.broadcast %69 : vector<16x1xf32> to vector<16x8xf32>
    %73 = arith.subf %64, %72 : vector<16x8xf32>
    %74 = math.exp %73 : vector<16x8xf32>
    %75 = arith.mulf %71, %66 : vector<16x1xf32>
    %cst_43 = arith.constant dense<0.000000e+00> : vector<16xf32>
    %76 = vector.multi_reduction <add>, %74, %cst_43 [1] : vector<16x8xf32> to vector<16xf32>
    %77 = vector.shape_cast %76 : vector<16xf32> to vector<16x1xf32>
    %78 = arith.addf %75, %77 : vector<16x1xf32>
    %c0_44 = arith.constant 0 : index
    %c2_45 = arith.constant 2 : index
    %79 = vector.load %arg8[%c0_44, %c2_45] : memref<16x4xf32, #tpu.memory_space<vmem>>, vector<16x1xf32>
    tpu.vector_store %arg8[%c0_44, %c2_45], %78 {strides = array<i32>} : memref<16x4xf32, #tpu.memory_space<vmem>>, vector<16x1xf32>,
    %cst_46 = arith.constant dense<0.000000e+00> : vector<16x8xf32>
    %80 = tpu.matmul %74, %63, %cst_46 {dimension_numbers = #tpu.dot_dimension_numbers<[1], [0], [0], [1], [0, 0, 1, 1], [], []>} : vector<16x8xf32>, vector<8x8xf32>, vector<16x8xf32> -> vector<16x8xf32>
    %c0_47 = arith.constant 0 : index
    %c16 = arith.constant 16 : index
    %81 = vector.load %arg9[%c0_47, %c16] : memref<16x32xf32, #tpu.memory_space<vmem>>, vector<16x8xf32>
    %82 = vector.broadcast %71 : vector<16x1xf32> to vector<16x8xf32>
    %83 = arith.mulf %82, %81 : vector<16x8xf32>
    %84 = arith.addf %83, %80 : vector<16x8xf32>
    %c0_48 = arith.constant 0 : index
    %c16_49 = arith.constant 16 : index
    %85 = vector.load %arg9[%c0_48, %c16_49] : memref<16x32xf32, #tpu.memory_space<vmem>>, vector<16x8xf32>
    tpu.vector_store %arg9[%c0_48, %c16_49], %84 {strides = array<i32>} : memref<16x32xf32, #tpu.memory_space<vmem>>, vector<16x8xf32>,
    %c0_50 = arith.constant 0 : index
    %c2_51 = arith.constant 2 : index
    %86 = vector.load %arg7[%c0_50, %c2_51] : memref<16x4xf32, #tpu.memory_space<vmem>>, vector<16x1xf32>
    tpu.vector_store %arg7[%c0_50, %c2_51], %69 {strides = array<i32>} : memref<16x4xf32, #tpu.memory_space<vmem>>, vector<16x1xf32>,
    %87 = vector.extract_strided_slice %4 {offsets = [0, 24], sizes = [16, 8], strides = [1, 1]} : vector<16x32xf32> to vector<16x8xf32>
    %88 = vector.extract_strided_slice %6 {offsets = [0, 24], sizes = [8, 8], strides = [1, 1]} : vector<8x32xf32> to vector<8x8xf32>
    %89 = vector.extract_strided_slice %8 {offsets = [0, 24], sizes = [8, 8], strides = [1, 1]} : vector<8x32xf32> to vector<8x8xf32>
    %cst_52 = arith.constant dense<0.000000e+00> : vector<16x8xf32>
    %90 = tpu.matmul %87, %88, %cst_52 {dimension_numbers = #tpu.dot_dimension_numbers<[1], [1], [0], [0], [0, 0, 1, 0], [], []>} : vector<16x8xf32>, vector<8x8xf32>, vector<16x8xf32> -> vector<16x8xf32>
    %c0_53 = arith.constant 0 : index
    %c3 = arith.constant 3 : index
    %91 = vector.load %arg7[%c0_53, %c3] : memref<16x4xf32, #tpu.memory_space<vmem>>, vector<16x1xf32>
    %c0_54 = arith.constant 0 : index
    %c3_55 = arith.constant 3 : index
    %92 = vector.load %arg8[%c0_54, %c3_55] : memref<16x4xf32, #tpu.memory_space<vmem>>, vector<16x1xf32>
    %cst_56 = arith.constant dense<0xFF800000> : vector<16xf32>
    %93 = vector.multi_reduction <maximumf>, %90, %cst_56 [1] : vector<16x8xf32> to vector<16xf32>
    %94 = vector.shape_cast %93 : vector<16xf32> to vector<16x1xf32>
    %95 = arith.maximumf %91, %94 : vector<16x1xf32>
    %96 = arith.subf %91, %95 : vector<16x1xf32>
    %97 = math.exp %96 : vector<16x1xf32>
    %98 = vector.broadcast %95 : vector<16x1xf32> to vector<16x8xf32>
    %99 = arith.subf %90, %98 : vector<16x8xf32>
    %100 = math.exp %99 : vector<16x8xf32>
    %101 = arith.mulf %97, %92 : vector<16x1xf32>
    %cst_57 = arith.constant dense<0.000000e+00> : vector<16xf32>
    %102 = vector.multi_reduction <add>, %100, %cst_57 [1] : vector<16x8xf32> to vector<16xf32>
    %103 = vector.shape_cast %102 : vector<16xf32> to vector<16x1xf32>
    %104 = arith.addf %101, %103 : vector<16x1xf32>
    %c0_58 = arith.constant 0 : index
    %c3_59 = arith.constant 3 : index
    %105 = vector.load %arg8[%c0_58, %c3_59] : memref<16x4xf32, #tpu.memory_space<vmem>>, vector<16x1xf32>
    tpu.vector_store %arg8[%c0_58, %c3_59], %104 {strides = array<i32>} : memref<16x4xf32, #tpu.memory_space<vmem>>, vector<16x1xf32>,
    %cst_60 = arith.constant dense<0.000000e+00> : vector<16x8xf32>
    %106 = tpu.matmul %100, %89, %cst_60 {dimension_numbers = #tpu.dot_dimension_numbers<[1], [0], [0], [1], [0, 0, 1, 1], [], []>} : vector<16x8xf32>, vector<8x8xf32>, vector<16x8xf32> -> vector<16x8xf32>
    %c0_61 = arith.constant 0 : index
    %c24 = arith.constant 24 : index
    %107 = vector.load %arg9[%c0_61, %c24] : memref<16x32xf32, #tpu.memory_space<vmem>>, vector<16x8xf32>
    %108 = vector.broadcast %97 : vector<16x1xf32> to vector<16x8xf32>
    %109 = arith.mulf %108, %107 : vector<16x8xf32>
    %110 = arith.addf %109, %106 : vector<16x8xf32>
    %c0_62 = arith.constant 0 : index
    %c24_63 = arith.constant 24 : index
    %111 = vector.load %arg9[%c0_62, %c24_63] : memref<16x32xf32, #tpu.memory_space<vmem>>, vector<16x8xf32>
    tpu.vector_store %arg9[%c0_62, %c24_63], %110 {strides = array<i32>} : memref<16x32xf32, #tpu.memory_space<vmem>>, vector<16x8xf32>,
    %c0_64 = arith.constant 0 : index
    %c3_65 = arith.constant 3 : index
    %112 = vector.load %arg7[%c0_64, %c3_65] : memref<16x4xf32, #tpu.memory_space<vmem>>, vector<16x1xf32>
    tpu.vector_store %arg7[%c0_64, %c3_65], %95 {strides = array<i32>} : memref<16x4xf32, #tpu.memory_space<vmem>>, vector<16x1xf32>,
    %c1_i32 = arith.constant 1 : i32
    %113 = arith.cmpi eq, %arg2, %c1_i32 : i32
    %114 = arith.extui %113 : i1 to i32
    %c0_i32_66 = arith.constant 0 : i32
    %115 = arith.cmpi ne, %114, %c0_i32_66 : i32
    scf.if %115 {
      %c0_67 = arith.constant 0 : index
      %c0_68 = arith.constant 0 : index
      %116 = vector.load %arg8[%c0_67, %c0_68] : memref<16x4xf32, #tpu.memory_space<vmem>>, vector<16x1xf32>
      %117 = tpu.reciprocal %116 {approx = true} : vector<16x1xf32> -> vector<16x1xf32>
      %c0_69 = arith.constant 0 : index
      %c0_70 = arith.constant 0 : index
      %118 = vector.load %arg9[%c0_69, %c0_70] : memref<16x32xf32, #tpu.memory_space<vmem>>, vector<16x8xf32>
      %119 = vector.broadcast %117 : vector<16x1xf32> to vector<16x8xf32>
      %120 = arith.mulf %118, %119 : vector<16x8xf32>
      %c0_71 = arith.constant 0 : index
      %c0_72 = arith.constant 0 : index
      %121 = vector.load %arg9[%c0_71, %c0_72] : memref<16x32xf32, #tpu.memory_space<vmem>>, vector<16x8xf32>
      tpu.vector_store %arg9[%c0_71, %c0_72], %120 {strides = array<i32>} : memref<16x32xf32, #tpu.memory_space<vmem>>, vector<16x8xf32>,
      %c0_73 = arith.constant 0 : index
      %c1_74 = arith.constant 1 : index
      %122 = vector.load %arg8[%c0_73, %c1_74] : memref<16x4xf32, #tpu.memory_space<vmem>>, vector<16x1xf32>
      %123 = tpu.reciprocal %122 {approx = true} : vector<16x1xf32> -> vector<16x1xf32>
      %c0_75 = arith.constant 0 : index
      %c8_76 = arith.constant 8 : index
      %124 = vector.load %arg9[%c0_75, %c8_76] : memref<16x32xf32, #tpu.memory_space<vmem>>, vector<16x8xf32>
      %125 = vector.broadcast %123 : vector<16x1xf32> to vector<16x8xf32>
      %126 = arith.mulf %124, %125 : vector<16x8xf32>
      %c0_77 = arith.constant 0 : index
      %c8_78 = arith.constant 8 : index
      %127 = vector.load %arg9[%c0_77, %c8_78] : memref<16x32xf32, #tpu.memory_space<vmem>>, vector<16x8xf32>
      tpu.vector_store %arg9[%c0_77, %c8_78], %126 {strides = array<i32>} : memref<16x32xf32, #tpu.memory_space<vmem>>, vector<16x8xf32>,
      %c0_79 = arith.constant 0 : index
      %c2_80 = arith.constant 2 : index
      %128 = vector.load %arg8[%c0_79, %c2_80] : memref<16x4xf32, #tpu.memory_space<vmem>>, vector<16x1xf32>
      %129 = tpu.reciprocal %128 {approx = true} : vector<16x1xf32> -> vector<16x1xf32>
      %c0_81 = arith.constant 0 : index
      %c16_82 = arith.constant 16 : index
      %130 = vector.load %arg9[%c0_81, %c16_82] : memref<16x32xf32, #tpu.memory_space<vmem>>, vector<16x8xf32>
      %131 = vector.broadcast %129 : vector<16x1xf32> to vector<16x8xf32>
      %132 = arith.mulf %130, %131 : vector<16x8xf32>
      %c0_83 = arith.constant 0 : index
      %c16_84 = arith.constant 16 : index
      %133 = vector.load %arg9[%c0_83, %c16_84] : memref<16x32xf32, #tpu.memory_space<vmem>>, vector<16x8xf32>
      tpu.vector_store %arg9[%c0_83, %c16_84], %132 {strides = array<i32>} : memref<16x32xf32, #tpu.memory_space<vmem>>, vector<16x8xf32>,
      %c0_85 = arith.constant 0 : index
      %c3_86 = arith.constant 3 : index
      %134 = vector.load %arg8[%c0_85, %c3_86] : memref<16x4xf32, #tpu.memory_space<vmem>>, vector<16x1xf32>
      %135 = tpu.reciprocal %134 {approx = true} : vector<16x1xf32> -> vector<16x1xf32>
      %c0_87 = arith.constant 0 : index
      %c24_88 = arith.constant 24 : index
      %136 = vector.load %arg9[%c0_87, %c24_88] : memref<16x32xf32, #tpu.memory_space<vmem>>, vector<16x8xf32>
      %137 = vector.broadcast %135 : vector<16x1xf32> to vector<16x8xf32>
      %138 = arith.mulf %136, %137 : vector<16x8xf32>
      %c0_89 = arith.constant 0 : index
      %c24_90 = arith.constant 24 : index
      %139 = vector.load %arg9[%c0_89, %c24_90] : memref<16x32xf32, #tpu.memory_space<vmem>>, vector<16x8xf32>
      tpu.vector_store %arg9[%c0_89, %c24_90], %138 {strides = array<i32>} : memref<16x32xf32, #tpu.memory_space<vmem>>, vector<16x8xf32>,
      %c0_91 = arith.constant 0 : index
      %c0_92 = arith.constant 0 : index
      %140 = vector.load %arg9[%c0_91, %c0_92] : memref<16x32xf32, #tpu.memory_space<vmem>>, vector<16x32xf32>
      %c0_93 = arith.constant 0 : index
      %c0_94 = arith.constant 0 : index
      %c0_95 = arith.constant 0 : index
      %141 = vector.load %arg6[%c0_93, %c0_94, %c0_95] : memref<1x16x32xf32, #tpu.memory_space<vmem>>, vector<1x16x32xf32>
      %142 = vector.shape_cast %141 : vector<1x16x32xf32> to vector<16x32xf32>
      %143 = vector.shape_cast %140 : vector<16x32xf32> to vector<1x16x32xf32>
      tpu.vector_store %arg6[%c0_93, %c0_94, %c0_95], %143 {strides = array<i32>} : memref<1x16x32xf32, #tpu.memory_space<vmem>>, vector<1x16x32xf32>,
    } else {
    }
    return
  }
  func.func @transform_0(%arg0: i32, %arg1: i32, %arg2: i32) -> (i32, i32, i32) {
    %c0_i32 = arith.constant 0 : i32
    %c0_i32_0 = arith.constant 0 : i32
    return %arg0, %c0_i32, %arg1 : i32, i32, i32
  }
  func.func @transform_1(%arg0: i32, %arg1: i32, %arg2: i32) -> (i32, i32, i32) {
    %c0_i32 = arith.constant 0 : i32
    return %arg0, %arg2, %arg1 : i32, i32, i32
  }
  func.func @transform_2(%arg0: i32, %arg1: i32, %arg2: i32) -> (i32, i32, i32) {
    %c0_i32 = arith.constant 0 : i32
    return %arg0, %arg2, %arg1 : i32, i32, i32
  }
  func.func @transform_3(%arg0: i32, %arg1: i32, %arg2: i32) -> (i32, i32, i32) {
    %c0_i32 = arith.constant 0 : i32
    %c0_i32_0 = arith.constant 0 : i32
    return %arg0, %c0_i32, %arg1 : i32, i32, i32
  }
}

</mosaic_0001>

<bundles_post_ra>
// kernel: gptsan_attention_forward.5
= control target key start
LH: loop header
LB: loop body
LE: loop exit
PB: predicated region body
PF: predicated region fallthrough
CT: control target
= control target key end

     0   :  { %vm30_vm0 = vcmask 261120   ;;  %s284_s0 = inlined_call_operand.vmem [shape: f32[32,32], index: 0, kind: input, shape index: {}]   ;;  %s285_s1 = inlined_call_operand.vmem [shape: f32[32,32], index: 1, kind: input, shape index: {}]   ;;  %s286_s2 = inlined_call_operand.vmem [shape: f32[1,32], index: 2, kind: input, shape index: {}]   ;;  %s287_s3 = inlined_call_operand.hbm [shape: f32[32,32], index: 3, kind: output, shape index: {}]  }
   0x1   :  { %v19_v0 = vld [vmem:[%s285_s1] sm:$0xff]  ;;  %v20_v1 = vld [vmem:[%s285_s1 + $0x8] sm:$0xff]  ;;  %v21_v2 = vld [vmem:[%s285_s1 + $0x10] sm:$0xff] }
   0x2   :  { %v175_v3 = vpack.c.bf16 %v20_v1, %v19_v0  ;;  %v22_v4 = vld [vmem:[%s285_s1 + $0x18] sm:$0xff]  ;;  %v15_v5 = vld [vmem:[%s284_s0] sm:$0xff]  ;;  %v17_v6 = vld [vmem:[%s284_s0 + $0x10] sm:$0xff] }
   0x3   :  { %v179_v7 = vpack.c.bf16 %v22_v4, %v21_v2  ;;  %169 = vmatprep.mubr.msk.f32.mxu0 %vm30_vm0, %v15_v5  ;;  %172 = vmatprep.mubr.msk.f32.mxu1 %vm30_vm0, %v17_v6 }
   0x4   :  { %8 = vsyncpa [#allocation3], 0  ;;  %176 = vmatprep.subr.bf16.mxu0 %v175_v3  ;;  %183 = vmatprep.subr.bf16.mxu1 %v175_v3  ;;  %v16_v8 = vld [vmem:[%s284_s0 + $0x8] sm:$0xff]  ;;  %v18_v9 = vld [vmem:[%s284_s0 + $0x18] sm:$0xff]  ;;  %s214_s29 = smov [#allocation2]  }
   0x5   :  { %178 = vmatpush3.bf16.msra.mxu0 %v175_v3  ;;  %185 = vmatpush3.bf16.msra.mxu1 %v175_v3  ;;  %v148_v10 = vld [vmem:[%s286_s2] ss:$0 sm:$0xff]  ;;  %s137_s30 = sshll.u32 %s214_s29, 4  ;;  %s138_s30 = int_to_ptr.vmem [resolvable:$true] %s137_s30 }
   0x6   :  { %180 = vmatprep.subr.bf16.mxu0 %v179_v7  ;;  %184 = vmatprep.subr.bf16.mxu1 %v179_v7  ;;  %s190_s0 = scalar_lea.vmem %s138_s30, 512  ;;  %p195_p1 = scmp.lt.s32.totalorder %s138_s30, %s138_s30 }
   0x7   :  { %p191_p0 = scmp.ne.s32.totalorder %s138_s30, %s190_s0  ;;  %p196_p2 = scmp.lt.s32.totalorder %s190_s0, %s190_s0 }
   0x9   :  { %182 = vmatpush3.bf16.msra.mxu0 %v179_v7  ;;  %186 = vmatpush3.bf16.msra.mxu1 %v179_v7  ;;  %p197_p3 = por %p196_p2, %p195_p1 }
   0xb   :  { %p198_p4 = pnand %p197_p3, %p191_p0 }
   0xc   :  { %170 = vmatmul.mubr.msk.f32.vlgmr.msra.gmra.mrb[0].mxu0 %vm30_vm0, %v16_v8  ;;  %173 = vmatmul.mubr.msk.f32.vlgmr.msra.gmra.mrb[0].mxu1 %vm30_vm0, %v18_v9 }
  0xdf   :  { %v171_v11 = vpop.f32.mrb[0].mxu0  ;;  %v174_v12 = vpop.f32.mrb[0].mxu1 }
  0xe0   :  { %v115_v13 = vadd.f32 %v171_v11, %v148_v10  ;;  %v125_v14 = vadd.f32 %v174_v12, %v148_v10  ;;  %v109_v15 = vpop.f32.mrb[1].mxu0  ;;  %v119_v16 = vpop.f32.mrb[1].mxu1 }
  0xe1   :  { %v110_v17 = vadd.f32 %v148_v10, %v109_v15  ;;  %v120_v18 = vadd.f32 %v148_v10, %v119_v16 }
  0xe2   :  { %129 = vst.msk [vmem:[#allocation2 + $0x8] sm:$0xff] %vm30_vm0, %v115_v13  ;;  %131 = vst.msk [vmem:[#allocation2 + $0x18] sm:$0xff] %vm30_vm0, %v125_v14 }
  0xe3   :  { %128 = vst.msk [vmem:[#allocation2] sm:$0xff] %vm30_vm0, %v110_v17  ;;  %130 = vst.msk [vmem:[#allocation2 + $0x10] sm:$0xff] %vm30_vm0, %v120_v18 }
  0xe4   :  { %201 = shalt.err (!%p198_p4)
}
  0xe5   :  { %s202_s5 = scalar_lea.hbm %s287_s3, 512 }
  0xe6   :  { %p203_p5 = scmp.ne.s32.totalorder %s287_s3, %s202_s5  ;;  %p206_p6 = scmp.lt.u32.totalorder %s202_s5, %s287_s3 }
  0xe8   :  { %p208_p7 = pnand %p206_p6, %p203_p5 }
  0xea   :  { %211 = shalt.err (!%p208_p7)
}
  0xeb   :  { %s215_s10 = smov 128   ;;  %s216_s11 = smov 8  }
  0xec   :  { %143 = dma.vmem_to_hbm [thread:$0]  %s138_s30, 512, %s287_s3, [#allocation3], %s215_s10, %s215_s10, %s216_s11  }
  0xed   :  { %212 = dma.done.wait [#allocation3], 512  }
  0xee   :  { %213 = vsyncadd [#allocation3], 4294966784 }
  0xef   :  { %147 = vsyncpa [#allocation3], 1 }

// kernel: gptsan_attention_forward.3
= control target key start
LH: loop header
LB: loop body
LE: loop exit
PB: predicated region body
PF: predicated region fallthrough
CT: control target
= control target key end

     0   :  { %11 = vsyncpa [#allocation3], 0  ;;  %s670_s0 = inlined_call_operand.hbm [shape: f32[32,32], index: 0, kind: input, shape index: {}]   ;;  %s671_s1 = inlined_call_operand.hbm [shape: f32[3,32,32], index: 1, kind: input, shape index: {}]   ;;  %s672_s2 = inlined_call_operand.vmem [shape: f32[3,1,32], index: 2, kind: input, shape index: {}]   ;;  %s673_s3 = inlined_call_operand.vmem [shape: f32[32,32], index: 3, kind: output, shape index: {0}]   ;;  %s674_s4 = inlined_call_operand.vmem [shape: f32[32,32], index: 4, kind: output, shape index: {1}]   ;;  %s675_s5 = inlined_call_operand.vmem [shape: f32[32,32], index: 5, kind: output, shape index: {2}]  }
   0x1   :  { %12 = vsyncpa [#allocation5], 0  ;;  %s543_s18 = smov [#allocation2]   ;;  %s495_s22 = scalar_lea.hbm %s670_s0, 512 }
   0x2   :  { %s18_s19 = sshll.u32 %s543_s18, 4  ;;  %p496_p0 = scmp.ne.s32.totalorder %s670_s0, %s495_s22  ;;  %s19_s19 = int_to_ptr.vmem [resolvable:$true] %s18_s19 }
   0x3   :  { %p499_p1 = scmp.lt.u32.totalorder %s495_s22, %s670_s0 }
   0x5   :  { %p501_p2 = pnand %p499_p1, %p496_p0 }
   0x7   :  { %504 = shalt.err (!%p501_p2)
}
   0x8   :  { %s505_s27 = scalar_lea.vmem %s19_s19, 512  ;;  %p510_p4 = scmp.lt.s32.totalorder %s19_s19, %s19_s19 }
   0x9   :  { %p506_p3 = scmp.ne.s32.totalorder %s19_s19, %s505_s27  ;;  %p511_p5 = scmp.lt.s32.totalorder %s505_s27, %s505_s27 }
   0xb   :  { %p512_p6 = por %p511_p5, %p510_p4 }
   0xd   :  { %p513_p7 = pnand %p512_p6, %p506_p3 }
   0xf   :  { %516 = shalt.err (!%p513_p7)
}
  0x10   :  { %s544_s28 = smov 128   ;;  %s545_s29 = smov 8  }
  0x11   :  { %24 = dma.hbm_to_vmem [thread:$0]  %s670_s0, 512, %s19_s19, [#allocation3], %s544_s28, %s544_s28, %s545_s29  }
  0x12   :  { %s546_s7 = smov [#allocation4]   ;;  %s517_s11 = scalar_lea.hbm %s671_s1, 1536 }
  0x13   :  { %s30_s8 = sshll.u32 %s546_s7, 4  ;;  %p518_p8 = scmp.ne.s32.totalorder %s671_s1, %s517_s11  ;;  %s31_s8 = int_to_ptr.vmem [resolvable:$true] %s30_s8 }
  0x14   :  { %p521_p9 = scmp.lt.u32.totalorder %s517_s11, %s671_s1 }
  0x16   :  { %p523_p10 = pnand %p521_p9, %p518_p8 }
  0x18   :  { %526 = shalt.err (!%p523_p10)
}
  0x19   :  { %s527_s16 = scalar_lea.vmem %s31_s8, 1536  ;;  %p532_p12 = scmp.lt.s32.totalorder %s31_s8, %s31_s8 }
  0x1a   :  { %p528_p11 = scmp.ne.s32.totalorder %s31_s8, %s527_s16  ;;  %p533_p13 = scmp.lt.s32.totalorder %s527_s16, %s527_s16 }
  0x1c   :  { %p534_p0 = por %p533_p13, %p532_p12 }
  0x1e   :  { %p535_p1 = pnand %p534_p0, %p528_p11 }
  0x20   :  { %538 = shalt.err (!%p535_p1)
}
  0x21   :  { %36 = dma.hbm_to_vmem [thread:$0]  %s671_s1, 1536, %s31_s8, [#allocation5], %s544_s28, %s544_s28, %s545_s29  }
  0x22   :  { %539 = dma.done.wait [#allocation3], 512  }
  0x23   :  { %540 = vsyncadd [#allocation3], 4294966784 }
  0x24   :  { %541 = dma.done.wait [#allocation5], 1536  }
  0x25   :  { %542 = vsyncadd [#allocation5], 4294965760  ;;  %v49_v0 = vld [vmem:[#allocation4] sm:$0xff]  ;;  %v50_v1 = vld [vmem:[#allocation4 + $0x8] sm:$0xff]  ;;  %vm60_vm0 = vcmask 261120  }
  0x26   :  { %v163_v2 = vld [vmem:[#allocation4 + $0x20] sm:$0xff]  ;;  %v463_v3 = vpack.c.bf16 %v50_v1, %v49_v0  ;;  %v164_v4 = vld [vmem:[#allocation4 + $0x28] sm:$0xff]  ;;  %v51_v5 = vld [vmem:[#allocation4 + $0x10] sm:$0xff] }
  0x27   :  { %v52_v6 = vld [vmem:[#allocation4 + $0x18] sm:$0xff]  ;;  %v471_v7 = vpack.c.bf16 %v164_v4, %v163_v2  ;;  %v165_v9 = vld [vmem:[#allocation4 + $0x30] sm:$0xff]  ;;  %v45_v11 = vld [vmem:[#allocation2] sm:$0xff] }
  0x28   :  { %v467_v8 = vpack.c.bf16 %v52_v6, %v51_v5  ;;  %v166_v10 = vld [vmem:[#allocation4 + $0x38] sm:$0xff]  ;;  %464 = vmatprep.subr.bf16.mxu0 %v463_v3  ;;  %429 = vmatprep.mubr.msk.f32.mxu0 %vm60_vm0, %v45_v11  ;;  %v265_v13 = vld [vmem:[#allocation4 + $0x40] sm:$0xff]  ;;  %v266_v14 = vld [vmem:[#allocation4 + $0x48] sm:$0xff] }
  0x29   :  { %v475_v12 = vpack.c.bf16 %v166_v10, %v165_v9  ;;  %472 = vmatprep.subr.bf16.mxu1 %v471_v7  ;;  %466 = vmatpush3.bf16.msra.mxu0 %v463_v3  ;;  %v479_v15 = vpack.c.bf16 %v266_v14, %v265_v13  ;;  %v267_v16 = vld [vmem:[#allocation4 + $0x50] sm:$0xff]  ;;  %v268_v17 = vld [vmem:[#allocation4 + $0x58] sm:$0xff]  ;;  %v46_v18 = vld [vmem:[#allocation2 + $0x8] sm:$0xff] }
  0x2a   :  { %474 = vmatpush3.bf16.msra.mxu1 %v471_v7  ;;  %468 = vmatprep.subr.bf16.mxu0 %v467_v8  ;;  %v47_v19 = vld [vmem:[#allocation2 + $0x10] sm:$0xff]  ;;  %v483_v20 = vpack.c.bf16 %v268_v17, %v267_v16  ;;  %v48_v21 = vld [vmem:[#allocation2 + $0x18] sm:$0xff]  ;;  %v380_v22 = vld [vmem:[%s672_s2] ss:$0 sm:$0xff] }
  0x2b   :  { %476 = vmatprep.subr.bf16.mxu1 %v475_v12  ;;  %443 = vmatprep.mubr.msk.f32.mxu1 %vm60_vm0, %v45_v11  ;;  %v386_v23 = vld [vmem:[%s672_s2 + $0x1] ss:$0 sm:$0xff]  ;;  %v392_v39 = vld [vmem:[%s672_s2 + $0x2] ss:$0 sm:$0xff] }
  0x2d   :  { %470 = vmatpush3.bf16.msra.mxu0 %v467_v8 }
  0x2e   :  { %478 = vmatpush3.bf16.msra.mxu1 %v475_v12  ;;  %480 = vmatprep.subr.bf16.mxu0 %v479_v15 }
  0x2f   :  { %487 = vmatprep.subr.bf16.mxu1 %v479_v15 }
  0x30   :  { %430 = vmatmul.mubr.msk.f32.vlgmr.msra.gmra.mrb[0].mxu0 %vm60_vm0, %v46_v18 }
  0x31   :  { %444 = vmatmul.mubr.msk.f32.vlgmr.msra.gmra.mrb[0].mxu1 %vm60_vm0, %v46_v18  ;;  %482 = vmatpush3.bf16.msra.mxu0 %v479_v15 }
  0x32   :  { %489 = vmatpush3.bf16.msra.mxu1 %v479_v15  ;;  %432 = vmatprep.mubr.msk.f32.mxu0 %vm60_vm0, %v47_v19 }
  0x33   :  { %446 = vmatprep.mubr.msk.f32.mxu1 %vm60_vm0, %v47_v19  ;;  %484 = vmatprep.subr.bf16.mxu0 %v483_v20 }
  0x34   :  { %433 = vmatmul.mubr.msk.f32.gmra.mrb[2].mxu0 %vm60_vm0, %v48_v21  ;;  %488 = vmatprep.subr.bf16.mxu1 %v483_v20 }
  0x35   :  { %447 = vmatmul.mubr.msk.f32.gmra.mrb[2].mxu1 %vm60_vm0, %v48_v21  ;;  %486 = vmatpush3.bf16.msra.mxu0 %v483_v20 }
  0x36   :  { %490 = vmatpush3.bf16.msra.mxu1 %v483_v20  ;;  %457 = vmatprep.mubr.msk.f32.mxu0 %vm60_vm0, %v45_v11 }
  0x37   :  { %460 = vmatprep.mubr.msk.f32.mxu1 %vm60_vm0, %v47_v19 }
  0x38   :  { %458 = vmatmul.mubr.msk.f32.vlgmr.msra.gmra.mrb[4].mxu0 %vm60_vm0, %v46_v18 }
  0x39   :  { %461 = vmatmul.mubr.msk.f32.vlgmr.msra.gmra.mrb[4].mxu1 %vm60_vm0, %v48_v21 }
 0x103   :  { %v431_v24 = vpop.f32.mrb[0].mxu0 }
 0x104   :  { %v145_v25 = vadd.f32 %v431_v24, %v380_v22  ;;  %v445_v26 = vpop.f32.mrb[0].mxu1  ;;  %v139_v27 = vpop.f32.mrb[1].mxu0 }
 0x105   :  { %v247_v28 = vadd.f32 %v445_v26, %v386_v23  ;;  %v140_v29 = vadd.f32 %v380_v22, %v139_v27  ;;  %v241_v30 = vpop.f32.mrb[1].mxu1 }
 0x106   :  { %159 = vst.msk [vmem:[%s673_s3 + $0x8] sm:$0xff] %vm60_vm0, %v145_v25  ;;  %v242_v31 = vadd.f32 %v386_v23, %v241_v30 }
 0x107   :  { %261 = vst.msk [vmem:[%s674_s4 + $0x8] sm:$0xff] %vm60_vm0, %v247_v28  ;;  %158 = vst.msk [vmem:[%s673_s3] sm:$0xff] %vm60_vm0, %v140_v29  ;;  %v434_v32 = vpop.f32.mrb[2].mxu0 }
 0x108   :  { %260 = vst.msk [vmem:[%s674_s4] sm:$0xff] %vm60_vm0, %v242_v31  ;;  %v155_v33 = vadd.f32 %v434_v32, %v380_v22  ;;  %v448_v34 = vpop.f32.mrb[2].mxu1  ;;  %v149_v35 = vpop.f32.mrb[3].mxu0 }
 0x109   :  { %v257_v36 = vadd.f32 %v448_v34, %v386_v23  ;;  %v150_v37 = vadd.f32 %v380_v22, %v149_v35  ;;  %v251_v38 = vpop.f32.mrb[3].mxu1 }
 0x10a   :  { %161 = vst.msk [vmem:[%s673_s3 + $0x18] sm:$0xff] %vm60_vm0, %v155_v33  ;;  %v252_v40 = vadd.f32 %v386_v23, %v251_v38 }
 0x10b   :  { %263 = vst.msk [vmem:[%s674_s4 + $0x18] sm:$0xff] %vm60_vm0, %v257_v36  ;;  %160 = vst.msk [vmem:[%s673_s3 + $0x10] sm:$0xff] %vm60_vm0, %v150_v37  ;;  %v459_v41 = vpop.f32.mrb[4].mxu0 }
 0x10c   :  { %262 = vst.msk [vmem:[%s674_s4 + $0x10] sm:$0xff] %vm60_vm0, %v252_v40  ;;  %v349_v42 = vadd.f32 %v459_v41, %v392_v39  ;;  %v462_v43 = vpop.f32.mrb[4].mxu1  ;;  %v343_v44 = vpop.f32.mrb[5].mxu0 }
 0x10d   :  { %v359_v45 = vadd.f32 %v462_v43, %v392_v39  ;;  %v344_v46 = vadd.f32 %v392_v39, %v343_v44  ;;  %v353_v47 = vpop.f32.mrb[5].mxu1 }
 0x10e   :  { %363 = vst.msk [vmem:[%s675_s5 + $0x8] sm:$0xff] %vm60_vm0, %v349_v42  ;;  %v354_v48 = vadd.f32 %v392_v39, %v353_v47 }
 0x10f   :  { %365 = vst.msk [vmem:[%s675_s5 + $0x18] sm:$0xff] %vm60_vm0, %v359_v45  ;;  %362 = vst.msk [vmem:[%s675_s5] sm:$0xff] %vm60_vm0, %v344_v46 }
 0x110   :  { %364 = vst.msk [vmem:[%s675_s5 + $0x10] sm:$0xff] %vm60_vm0, %v354_v48 }
 0x111   :  { %378 = vsyncpa [#allocation3], 1 }
 0x112   :  { %379 = vsyncpa [#allocation5], 1 }

// kernel: gptsan_attention_forward.4
= control target key start
LH: loop header
LB: loop body
LE: loop exit
PB: predicated region body
PF: predicated region fallthrough
CT: control target
= control target key end

     0   :  { %s1793_s12 = smov 0   ;;  %s1795_s13 = smov 0   ;;  %s2085_s0 = inlined_call_operand.vmem [shape: f32[2,16,32], index: 0, kind: input, shape index: {}]   ;;  %s2086_s1 = inlined_call_operand.vmem [shape: f32[2,16,32], index: 1, kind: input, shape index: {}]   ;;  %s2087_s2 = inlined_call_operand.vmem [shape: f32[2,16,32], index: 2, kind: input, shape index: {}]   ;;  %s2088_s3 = inlined_call_operand.vmem [shape: f32[2,16,32], index: 3, kind: output, shape index: {}]  }
   0x1   :  { %s1797_s14 = smov 0   ;;  %s1799_s15 = smov 0  }
   0x2   :  { %s1801_s16 = smov 0  }
   0x3 LB: > { %s25_s17 = sadd.s32 1, %s1747_s14  ;;  %s32_s18 = sadd.s32 1, %s1751_s15  ;;  %s1755_s16 = sphi %s1801_s16, %s13_s16   ;;  %s1751_s15 = sphi %s1799_s15, %s2092_s15   ;;  %s1747_s14 = sphi %s1797_s14, %s2091_s14   ;;  %s1743_s13 = sphi %s1795_s13, %s2090_s13   ;;  %s1739_s12 = sphi %s1793_s12, %s2089_s12  }
   0x4   : > { %p26_p0 = scmp.ge.s32.totalorder %s25_s17, 2  ;;  %p1508_p1 = scmp.ge.s32.totalorder %s1755_s16, 1 }
   0x5   : > { %p203_p2 = scmp.lt.s32.totalorder %s1755_s16, 5 }
   0x6   : > { %s2094_s17 = smov (%p26_p0, %s25_s17), 0  ;;  %s2096_s18 = smov (!%p26_p0, %s32_s18), %s1751_s15 }
   0x7   : > { %p204_p3 = pnand %p1508_p1, %p203_p2  ;;  %p34_p4 = scmp.ge.s32.totalorder %s2096_s18, 2 }
   0x8   : > { %p255_p5 = scmp.lt.s32.totalorder (!%p204_p3), %s1743_s13, 1  ;;  %p265_p6 = scmp.lt.s32.totalorder (!%p204_p3), %s1739_s12, 1 }
   0x9   : > { %s2098_s18 = smov (%p34_p4, %s2096_s18), 0  ;;  %207 = sbr.rel (%p204_p3) target bundleno = 1631 (0x65f), region = 32 }
   0xa   : > { %p1517_p7 = scmp.ne.s32.totalorder (!%p204_p3), %s1739_s12, 0 }
  0x10   : > { %s2100_s13 = smov (!%p255_p5, %s1743_s13), 1  ;;  %296 = sbr.rel (%p1517_p7) target bundleno = 23 (0x17), region = 36 }
  0x11   : > { %s266_s19 = scalar_select %p265_p6, %s1739_s12, 1 }
  0x12   : > { %s1541_s20 = sshll.u32 %s2100_s13, 4  ;;  %s1511_s21 = sshll.u32 %s2100_s13, 1  ;;  %vm297_vm0 = vcmask (!%p1517_p7), 31744   ;;  %vm302_vm1 = vcmask (!%p1517_p7), 261120   ;;  %v1757_v0 = vmov (!%p1517_p7), -inf   ;;  %v1758_v1 = vmov (!%p1517_p7), 0.0  }
  0x13   : > { %s262_s24 = scalar_lea.vmem %s2085_s0, %s1541_s20  ;;  %s271_s25 = sadd.s32 %s1511_s21, %s266_s19  ;;  %298 = vst.msk [vmem:[#allocation2] sm:$0xff] (!%p1517_p7), %vm297_vm0, %v1757_v0  ;;  %299 = vst.msk [vmem:[#allocation2 + $0x8] sm:$0xff] (!%p1517_p7), %vm297_vm0, %v1757_v0 }
  0x14   : > { %s1512_s26 = sshll.u32 %s271_s25, 3  ;;  %s1833_s29 = scalar_lea.vmem %s2088_s3, %s1541_s20  ;;  %300 = vst.msk [vmem:[#allocation3] sm:$0xff] (!%p1517_p7), %vm297_vm0, %v1758_v1  ;;  %301 = vst.msk [vmem:[#allocation3 + $0x8] sm:$0xff] (!%p1517_p7), %vm297_vm0, %v1758_v1 }
  0x15   : > { %s273_s5 = scalar_lea.vmem %s2086_s1, %s1512_s26  ;;  %s1841_s8 = scalar_lea.vmem %s2087_s2, %s1512_s26  ;;  %303 = vst.msk [vmem:[#allocation4] sm:$0xff] (!%p1517_p7), %vm302_vm1, %v1758_v1  ;;  %304 = vst.msk [vmem:[#allocation4 + $0x8] sm:$0xff] (!%p1517_p7), %vm302_vm1, %v1758_v1 }
  0x17 PF: > { %v307_v2 = vld [vmem:[%s273_s5] sm:$0xff]  ;;  %vm309_vm2 = vcmask 64512   ;;  %v306_v4 = vld [vmem:[%s262_s24 + $0x8] sm:$0xff]  ;;  %v1759_v9 = vmov 0   ;;  %s1760_s9 = smov 120   ;;  %s1761_s10 = smov 104  }
  0x18   : > { %v305_v3 = vld [vmem:[%s262_s24] sm:$0xff]  ;;  %1567 = vmatprep.subr.msk.mxu0 %vm309_vm2, %v307_v2  ;;  %1663 = vset.pattern.permute.xlu1 %v1759_v9  ;;  %vm438_vm3 = vcmask 7168   ;;  %s1762_s11 = smov 112   ;;  %v1763_v50 = vmov 1   ;;  %vm673_vm4 = vcmask 15368   ;;  %v1764_v59 = vmov 2  }
  0x19   : > { %1569 = vmatprep.mubr.msk.f32.mxu0 %vm309_vm2, %v305_v3  ;;  %1568 = vmatpush3.xpose.msk.msra.mxu0 %vm309_vm2, %v307_v2  ;;  %v1875_v18 = vld [vmem:[%s1841_s8] sm:$0xff]  ;;  %vm921_vm5 = vcmask 23568   ;;  %vm1168_vm6 = vcmask 31768   ;;  %s1766_s13 = smov 8   ;;  %s1767_s19 = smov 24   ;;  %vm785_vm7 = vcmask 130112  }
  0x1a   : > { %v1853_v10 = vld [vmem:[#allocation2] sm:$0xff]  ;;  %v1858_v13 = vld [vmem:[#allocation2 + $0x8] sm:$0xff]  ;;  %1572 = vmatprep.subr.mxu1 %v1875_v18  ;;  %1665 = vset.pattern.permute.xlu0 %v1763_v50  ;;  %s1768_s20 = smov 16   ;;  %vm1032_vm8 = vcmask 195712   ;;  %vm1279_vm9 = vcmask 261312   ;;  %p1538_p8 = scmp.ne.s32.totalorder %s1739_s12, 1 }
  0x1b   : > { %1573 = vmatpush3.msra.mxu1 %v1875_v18  ;;  %vm1370_vm10 = vcmask (!%p1538_p8), 261120  }
  0x1c   : > { %1570 = vmatmul.mubr.msk.f32.vlgmr.msra.gmra.mrb[0].mxu0 %vm309_vm2, %v306_v4 }
  0xef   : > { %v1571_v5 = vpop.f32.mrb[0].mxu0 }
  0xf0   : > { %v385_v6 = vpop.f32.mrb[1].mxu0  ;;  %v401_v8 = vsel %vm309_vm2, %v1571_v5, -inf }
  0xf1   : > { %v398_v7 = vsel %vm309_vm2, %v385_v6, -inf }
  0xf2   : > { %399 = vmax.xlane.f32.xlu0 %v398_v7 }
  0xf6   : > { %402 = vmax.xlane.f32.xlu0 %v401_v8 }
 0x10c   : > { %546 = vrot.lane.b32.xlu0 %v307_v2, %s1760_s9 }
 0x110   : > { %1037 = vrot.lane.b32.xlu0 %v305_v3, %s1761_s10 }
 0x17f   : > { %v400_v11 = vpop.xlane.xlu0 %399 }
 0x180   : > { %v1856_v12 = vmax.f32 %v1853_v10, %v400_v11 }
 0x182   : > { %v406_v14 = vsub.f32 %v1853_v10, %v1856_v12  ;;  %540 = vst.msk [vmem:[#allocation2] sm:$0xff] %vm438_vm3, %v1856_v12  ;;  %414 = vperm.xlu1 %1663, %v1856_v12  }
 0x183   : > { %v403_v15 = vpop.xlane.xlu0 %402 }
 0x184   : > { %v1866_v16 = vmax.f32 %v1858_v13, %v403_v15  ;;  %v1765_v15 = vmov 3  }
 0x186   : > { %v407_v17 = vsub.f32 %v1858_v13, %v1866_v16  ;;  %541 = vst.msk [vmem:[#allocation2 + $0x8] sm:$0xff] %vm438_vm3, %v1866_v16  ;;  %419 = vperm.xlu1 %1663, %v1866_v16  }
 0x187   : > { %v547_v19 = vpop.permute.xlu0 %546 }
 0x188   : > { %1577 = vmatprep.subr.msk.mxu1 %vm309_vm2, %v547_v19  ;;  %v410_v10 = vmul.f32 1.442695, %v407_v17 }
 0x189   : > { %v629_v54 = vld [vmem:[#allocation2] sm:$0xff] }
 0x18a   : > { %542 = vrot.lane.b32.xlu1 %v305_v3, %s1760_s9 }
 0x18b   : > { %v1038_v33 = vpop.permute.xlu0 %1037  ;;  %1664 = vset.pattern.permute.xlu1 %v1763_v50 }
 0x18d   : > { %v630_v51 = vld [vmem:[#allocation2 + $0x8] sm:$0xff] }
 0x18e   : > { %544 = vrot.lane.b32.xlu1 %v306_v4, %s1760_s9 }
 0x192   : > { %794 = vrot.lane.b32.xlu1 %v307_v2, %s1762_s11 }
 0x196   : > { %790 = vrot.lane.b32.xlu1 %v305_v3, %s1762_s11 }
 0x19a   : > { %792 = vrot.lane.b32.xlu1 %v306_v4, %s1762_s11 }
 0x19e   : > { %1041 = vrot.lane.b32.xlu1 %v307_v2, %s1761_s10 }
 0x1a2   : > { %1039 = vrot.lane.b32.xlu1 %v306_v4, %s1761_s10 }
 0x201   : > { %v415_v20 = vpop.permute.xlu1 %414 }
 0x202   : > { %v422_v21 = vsub.f32 %v385_v6, %v415_v20 }
 0x204   : > { %v424_v22 = vmul.f32 1.442695, %v422_v21  ;;  %v408_v21 = vmul.f32 1.442695, %v406_v14 }
 0x205   : > { %v420_v23 = vpop.permute.xlu1 %419 }
 0x206   : > { %1675 = vpow2.f32 %v424_v22  ;;  %v423_v24 = vsub.f32 %v1571_v5, %v420_v23 }
 0x208   : > { %v426_v25 = vmul.f32 1.442695, %v423_v24 }
 0x209   : > { %v543_v26 = vpop.permute.xlu1 %542 }
 0x20a   : > { %1677 = vpow2.f32 %v426_v25 }
 0x20b   : > { %1679 = vpow2.f32 %v408_v21  ;;  %v397_v21 = vld [vmem:[#allocation3 + $0x8] sm:$0xff] }
 0x20d   : > { %v545_v27 = vpop.permute.xlu1 %544 }
 0x210   : > { %v1886_v28 = vpop.eup %1675 }
 0x211   : > { %1574 = vmatprep.mubr.msk.f32.mxu1 %vm309_vm2, %v1886_v28  ;;  %v795_v29 = vpop.permute.xlu1 %794  ;;  %v430_v20 = vsel %vm309_vm2, %v1886_v28, 0.0 }
 0x214   : > { %v1890_v30 = vpop.eup %1677 }
 0x215   : > { %1575 = vmatmul.mubr.msk.f32.vlgmr.msra.gmra.mrb[0].mxu1 %vm309_vm2, %v1890_v30  ;;  %v791_v31 = vpop.permute.xlu1 %790  ;;  %v1972_v24 = vpop.eup %1679 }
 0x216   : > { %1578 = vmatpush3.xpose.msk.msra.mxu1 %vm309_vm2, %v547_v19  ;;  %1579 = vmatprep.mubr.msk.f32.mxu1 %vm309_vm2, %v543_v26 }
 0x217   : > { %1587 = vmatprep.subr.msk.mxu1 %vm309_vm2, %v795_v29 }
 0x219   : > { %1580 = vmatmul.mubr.msk.f32.vlgmr.msra.gmra.mrb[2].mxu1 %vm309_vm2, %v545_v27  ;;  %v793_v32 = vpop.permute.xlu1 %792 }
 0x21a   : > { %1588 = vmatpush3.xpose.msk.msra.mxu1 %vm309_vm2, %v795_v29  ;;  %1589 = vmatprep.mubr.msk.f32.mxu1 %vm309_vm2, %v791_v31 }
 0x21d   : > { %1590 = vmatmul.mubr.msk.f32.vlgmr.msra.gmra.mrb[4].mxu1 %vm309_vm2, %v793_v32  ;;  %v1042_v34 = vpop.permute.xlu1 %1041 }
 0x21e   : > { %1597 = vmatprep.subr.msk.mxu1 %vm309_vm2, %v1042_v34  ;;  %1599 = vmatprep.mubr.msk.f32.mxu1 %vm309_vm2, %v1038_v33 }
 0x21f   : > { %1598 = vmatpush3.xpose.msk.msra.mxu1 %vm309_vm2, %v1042_v34 }
 0x221   : > { %v1040_v35 = vpop.permute.xlu1 %1039 }
 0x222   : > { %1600 = vmatmul.mubr.msk.f32.vlgmr.msra.gmra.mrb[6].mxu1 %vm309_vm2, %v1040_v35 }
 0x2e8   : > { %v1905_v36 = vpop.f32.mrb[0].mxu1 }
 0x2e9   : > { %v1907_v37 = vpop.f32.mrb[1].mxu1 }
 0x2ec   : > { %v1909_v38 = vpop.f32.mrb[2].mxu1 }
 0x2ed   : > { %v1911_v39 = vpop.f32.mrb[3].mxu1  ;;  %v636_v40 = vsel %vm309_vm2, %v1909_v38, -inf }
 0x2ee   : > { %637 = vmax.xlane.f32.xlu1 %v636_v40  ;;  %v633_v41 = vsel %vm309_vm2, %v1911_v39, -inf }
 0x2ef   : > { %634 = vmax.xlane.f32.xlu0 %v633_v41 }
 0x2f0   : > { %v1917_v42 = vpop.f32.mrb[4].mxu1 }
 0x2f1   : > { %v1919_v43 = vpop.f32.mrb[5].mxu1  ;;  %v884_v45 = vsel %vm309_vm2, %v1917_v42, -inf }
 0x2f2   : > { %v881_v44 = vsel %vm309_vm2, %v1919_v43, -inf }
 0x2f3   : > { %882 = vmax.xlane.f32.xlu0 %v881_v44 }
 0x2f5   : > { %v1925_v46 = vpop.f32.mrb[6].mxu1 }
 0x2f6   : > { %v1927_v47 = vpop.f32.mrb[7].mxu1  ;;  %v1131_v49 = vsel %vm309_vm2, %v1925_v46, -inf }
 0x2f7   : > { %885 = vmax.xlane.f32.xlu0 %v884_v45  ;;  %v1128_v48 = vsel %vm309_vm2, %v1927_v47, -inf }
 0x2f8   : > { %1129 = vmax.xlane.f32.xlu1 %v1128_v48 }
 0x2fb   : > { %1132 = vmax.xlane.f32.xlu0 %v1131_v49 }
 0x37b   : > { %v638_v52 = vpop.xlane.xlu1 %637 }
 0x37c   : > { %v640_v53 = vmax.f32 %v630_v51, %v638_v52  ;;  %v635_v55 = vpop.xlane.xlu0 %634 }
 0x37d   : > { %v639_v56 = vmax.f32 %v629_v54, %v635_v55 }
 0x37e   : > { %789 = vst.msk [vmem:[#allocation2 + $0x8] sm:$0xff] %vm673_vm4, %v640_v53  ;;  %654 = vperm.xlu0 %1665, %v640_v53   ;;  %v642_v22 = vsub.f32 %v630_v51, %v640_v53 }
 0x37f   : > { %v641_v57 = vsub.f32 %v629_v54, %v639_v56  ;;  %788 = vst.msk [vmem:[#allocation2] sm:$0xff] %vm673_vm4, %v639_v56  ;;  %649 = vperm.xlu1 %1664, %v639_v56  }
 0x380   : > { %v883_v58 = vpop.xlane.xlu0 %882  ;;  %v645_v23 = vmul.f32 1.442695, %v642_v22 }
 0x381   : > { %v643_v12 = vmul.f32 1.442695, %v641_v57 }
 0x382   : > { %1668 = vset.pattern.permute.xlu0 %v1759_v9  ;;  %1681 = vpow2.f32 %v645_v23 }
 0x383   : > { %1666 = vset.pattern.permute.xlu1 %v1764_v59  ;;  %1683 = vpow2.f32 %v410_v10 }
 0x384   : > { %v886_v60 = vpop.xlane.xlu0 %885  ;;  %1685 = vpow2.f32 %v643_v12 }
 0x385   : > { %v878_v61 = vld [vmem:[#allocation2 + $0x8] sm:$0xff]  ;;  %v1130_v4 = vpop.xlane.xlu1 %1129 }
 0x386   : > { %v877_v62 = vld [vmem:[#allocation2] sm:$0xff]  ;;  %v888_v63 = vmax.f32 %v878_v61, %v886_v60 }
 0x387   : > { %v887_v0 = vmax.f32 %v877_v62, %v883_v58 }
 0x388   : > { %v890_v1 = vsub.f32 %v878_v61, %v888_v63  ;;  %1036 = vst.msk [vmem:[#allocation2 + $0x8] sm:$0xff] %vm921_vm5, %v888_v63  ;;  %v1133_v3 = vpop.xlane.xlu0 %1132 }
 0x389   : > { %v889_v2 = vsub.f32 %v877_v62, %v887_v0  ;;  %1035 = vst.msk [vmem:[#allocation2] sm:$0xff] %vm921_vm5, %v887_v0  ;;  %897 = vperm.xlu1 %1666, %v887_v0  }
 0x38a   : > { %v893_v14 = vmul.f32 1.442695, %v890_v1 }
 0x38b   : > { %v891_v26 = vmul.f32 1.442695, %v889_v2  ;;  %v522_v2 = vld [vmem:[#allocation4] sm:$0xff] }
 0x38c   : > { %v1975_v25 = vpop.eup %1681  ;;  %1687 = vpow2.f32 %v893_v14 }
 0x38d   : > { %902 = vperm.xlu1 %1666, %v888_v63   ;;  %1689 = vpow2.f32 %v891_v26 }
 0x38f   : > { %v1940_v5 = vld [vmem:[#allocation2 + $0x8] sm:$0xff] }
 0x390   : > { %v1943_v6 = vmax.f32 %v1940_v5, %v1133_v3  ;;  %v1945_v7 = vld [vmem:[#allocation2] sm:$0xff] }
 0x391   : > { %v1948_v8 = vmax.f32 %v1945_v7, %v1130_v4  ;;  %677 = vrot.lane.b32.xlu1 %v1875_v18, %s1760_s9 }
 0x392   : > { %v1137_v11 = vsub.f32 %v1940_v5, %v1943_v6  ;;  %1283 = vst.msk [vmem:[#allocation2 + $0x8] sm:$0xff] %vm1168_vm6, %v1943_v6  ;;  %1667 = vset.pattern.permute.xlu1 %v1765_v15 }
 0x393   : > { %v1136_v19 = vsub.f32 %v1945_v7, %v1948_v8  ;;  %1282 = vst.msk [vmem:[#allocation2] sm:$0xff] %vm1168_vm6, %v1948_v8 }
 0x395   : > { %1144 = vperm.xlu1 %1667, %v1948_v8   ;;  %v1138_v1 = vmul.f32 1.442695, %v1136_v19 }
 0x399   : > { %1149 = vperm.xlu1 %1667, %v1943_v6  }
 0x39d   : > { %431 = vadd.xlane.f32.xlu0 %v430_v20  ;;  %924 = vrot.lane.b32.xlu1 %v1875_v18, %s1762_s11 }
 0x39e   : > { %1669 = vset.pattern.permute.xlu1 %v1759_v9  ;;  %v433_v9 = vsel %vm309_vm2, %v1890_v30, 0.0 }
 0x3a1   : > { %1171 = vrot.lane.b32.xlu1 %v1875_v18, %s1761_s10  ;;  %v1984_v18 = vpop.eup %1683 }
 0x3a2   : > { %v1987_v27 = vpop.eup %1685  ;;  %v429_v22 = vmul.f32 %v1984_v18, %v397_v21 }
 0x3a3   : > { %v1991_v28 = vpop.eup %1687 }
 0x3a4   : > { %v1994_v13 = vpop.eup %1689 }
 0x3b3   : > { %526 = vperm.xlu0 %1668, %v1972_v24  }
 0x3b7   : > { %1671 = vset.pattern.permute.xlu0 %v1763_v50 }
 0x3b8   : > { %770 = vperm.xlu0 %1671, %v1975_v25  }
 0x3bc   : > { %1673 = vset.pattern.permute.xlu0 %v1765_v15 }
 0x3c5   : > { %434 = vadd.xlane.f32.xlu1 %v433_v9  ;;  %v523_v9 = vld [vmem:[#allocation4 + $0x8] sm:$0xff] }
 0x3d6   : > { %531 = vperm.xlu1 %1669, %v1984_v18  }
 0x3da   : > { %1670 = vset.pattern.permute.xlu1 %v1763_v50 }
 0x3db   : > { %765 = vperm.xlu1 %1670, %v1987_v27  }
 0x3df   : > { %1672 = vset.pattern.permute.xlu1 %v1764_v59 }
 0x3e0   : > { %1017 = vperm.xlu1 %1672, %v1991_v28  }
 0x3e4   : > { %1012 = vperm.xlu1 %1672, %v1994_v13  }
 0x3e8   : > { %1674 = vset.pattern.permute.xlu1 %v1765_v15 }
 0x3fd   : > { %v655_v16 = vpop.permute.xlu0 %654 }
 0x3fe   : > { %v658_v17 = vsub.f32 %v1909_v38, %v655_v16  ;;  %v650_v29 = vpop.permute.xlu1 %649 }
 0x3ff   : > { %v657_v30 = vsub.f32 %v1911_v39, %v650_v29 }
 0x400   : > { %v661_v31 = vmul.f32 1.442695, %v658_v17 }
 0x401   : > { %v659_v32 = vmul.f32 1.442695, %v657_v30 }
 0x402   : > { %1691 = vpow2.f32 %v661_v31 }
 0x403   : > { %1693 = vpow2.f32 %v659_v32 }
 0x408   : > { %v898_v33 = vpop.permute.xlu1 %897 }
 0x409   : > { %v905_v34 = vsub.f32 %v1919_v43, %v898_v33 }
 0x40b   : > { %v907_v35 = vmul.f32 1.442695, %v905_v34 }
 0x40c   : > { %v1692_v40 = vpop.eup %1691  ;;  %v903_v41 = vpop.permute.xlu1 %902 }
 0x40d   : > { %v1694_v44 = vpop.eup %1693  ;;  %1695 = vpow2.f32 %v907_v35  ;;  %v906_v45 = vsub.f32 %v1917_v42, %v903_v41  ;;  %v668_v48 = vsel %vm309_vm2, %v1692_v40, 0.0 }
 0x40e   : > { %1584 = vmatprep.mubr.msk.f32.mxu0 %vm309_vm2, %v1694_v44  ;;  %669 = vadd.xlane.f32.xlu0 %v668_v48  ;;  %v665_v38 = vsel %vm309_vm2, %v1694_v44, 0.0 }
 0x40f   : > { %v909_v39 = vmul.f32 1.442695, %v906_v45  ;;  %666 = vadd.xlane.f32.xlu1 %v665_v38 }
 0x410   : > { %v678_v49 = vpop.permute.xlu1 %677 }
 0x411   : > { %1697 = vpow2.f32 %v909_v39  ;;  %1582 = vmatprep.subr.mxu0 %v678_v49 }
 0x412   : > { %1583 = vmatpush3.msra.mxu0 %v678_v49 }
 0x413   : > { %1585 = vmatmul.mubr.msk.f32.vlgmr.msra.gmra.mrb[2].mxu0 %vm309_vm2, %v1692_v40 }
 0x414   : > { %v1145_v43 = vpop.permute.xlu1 %1144 }
 0x415   : > { %v1152_v50 = vsub.f32 %v1927_v47, %v1145_v43 }
 0x417   : > { %v1696_v51 = vpop.eup %1695  ;;  %v1154_v42 = vmul.f32 1.442695, %v1152_v50 }
 0x418   : > { %v1150_v52 = vpop.permute.xlu1 %1149  ;;  %1594 = vmatprep.mubr.msk.f32.mxu0 %vm309_vm2, %v1696_v51  ;;  %v913_v53 = vsel %vm309_vm2, %v1696_v51, 0.0 }
 0x419   : > { %1699 = vpow2.f32 %v1154_v42  ;;  %v1153_v54 = vsub.f32 %v1925_v46, %v1150_v52  ;;  %914 = vadd.xlane.f32.xlu1 %v913_v53  ;;  %v396_v46 = vld [vmem:[#allocation3] sm:$0xff] }
 0x41a   : > { %v428_v62 = vmul.f32 %v1972_v24, %v396_v46 }
 0x41b   : > { %v1698_v55 = vpop.eup %1697  ;;  %v1156_v56 = vmul.f32 1.442695, %v1153_v54 }
 0x41c   : > { %v925_v57 = vpop.permute.xlu1 %924  ;;  %v916_v58 = vsel %vm309_vm2, %v1698_v55, 0.0 }
 0x41d   : > { %1701 = vpow2.f32 %v1156_v56  ;;  %1592 = vmatprep.subr.mxu0 %v925_v57  ;;  %917 = vadd.xlane.f32.xlu0 %v916_v58 }
 0x41e   : > { %1593 = vmatpush3.msra.mxu0 %v925_v57  ;;  %1703 = vpow2.f32 %v1138_v1 }
 0x41f   : > { %1595 = vmatmul.mubr.msk.f32.vlgmr.msra.gmra.mrb[4].mxu0 %vm309_vm2, %v1698_v55 }
 0x420   : > { %v1172_v47 = vpop.permute.xlu1 %1171 }
 0x421   : > { %1602 = vmatprep.subr.mxu0 %v1172_v47 }
 0x422   : > { %1603 = vmatpush3.msra.mxu0 %v1172_v47 }
 0x423   : > { %v2011_v59 = vpop.eup %1699 }
 0x424   : > { %1604 = vmatprep.mubr.msk.f32.mxu0 %vm309_vm2, %v2011_v59  ;;  %v1160_v50 = vsel %vm309_vm2, %v2011_v59, 0.0 }
 0x427   : > { %v1702_v60 = vpop.eup %1701 }
 0x428   : > { %1605 = vmatmul.mubr.msk.f32.vlgmr.msra.gmra.mrb[6].mxu0 %vm309_vm2, %v1702_v60  ;;  %v1163_v61 = vsel %vm309_vm2, %v1702_v60, 0.0  ;;  %v2024_v20 = vpop.eup %1703 }
 0x429   : > { %1164 = vadd.xlane.f32.xlu0 %v1163_v61 }
 0x42a   : > { %v432_v63 = vpop.xlane.xlu0 %431 }
 0x42b   : > { %v436_v0 = vadd.f32 %v432_v63, %v428_v62 }
 0x42d   : > { %439 = vst.msk [vmem:[#allocation3] sm:$0xff] %vm438_vm3, %v436_v0 }
 0x432   : > { %v527_v3 = vpop.permute.xlu0 %526 }
 0x433   : > { %v534_v4 = vmul.f32 %v527_v3, %v522_v2 }
 0x434   : > { %v631_v16 = vld [vmem:[#allocation3] sm:$0xff] }
 0x435   : > { %v536_v15 = vadd.f32 %v534_v4, %v1907_v37  ;;  %v663_v29 = vmul.f32 %v1987_v27, %v631_v16  ;;  %v1771_v16 = vmov (!%p1538_p8), 2  }
 0x437   : > { %538 = vst.msk [vmem:[#allocation4] sm:$0xff] %vm309_vm2, %v536_v15  ;;  %v771_v12 = vpop.permute.xlu0 %770 }
 0x43e   : > { %v761_v54 = vld [vmem:[#allocation4] sm:$0xff] }
 0x43f   : > { %1259 = vperm.xlu0 %1673, %v2024_v20  }
 0x452   : > { %v435_v23 = vpop.xlane.xlu1 %434 }
 0x453   : > { %v437_v24 = vadd.f32 %v435_v23, %v429_v22 }
 0x455   : > { %440 = vst.msk [vmem:[#allocation3 + $0x8] sm:$0xff] %vm438_vm3, %v437_v24 }
 0x456   : > { %v532_v7 = vpop.permute.xlu1 %531 }
 0x457   : > { %v535_v8 = vmul.f32 %v532_v7, %v523_v9 }
 0x459   : > { %v537_v19 = vadd.f32 %v1905_v36, %v535_v8  ;;  %v1140_v36 = vmul.f32 1.442695, %v1137_v11 }
 0x45a   : > { %v766_v37 = vpop.permute.xlu1 %765 }
 0x45b   : > { %539 = vst.msk [vmem:[#allocation4 + $0x8] sm:$0xff] %vm309_vm2, %v537_v19  ;;  %1705 = vpow2.f32 %v1140_v36  ;;  %v773_v55 = vmul.f32 %v766_v37, %v761_v54 }
 0x45c   : > { %v632_v14 = vld [vmem:[#allocation3 + $0x8] sm:$0xff] }
 0x45d   : > { %v664_v18 = vmul.f32 %v1975_v25, %v632_v14 }
 0x45f   : > { %v2031_v10 = vpop.permute.xlu1 %1017 }
 0x462   : > { %v762_v51 = vld [vmem:[#allocation4 + $0x8] sm:$0xff] }
 0x463   : > { %v2033_v26 = vpop.permute.xlu1 %1012  ;;  %v774_v42 = vmul.f32 %v771_v12, %v762_v51  ;;  %v1770_v12 = vmov (!%p1538_p8), 1  }
 0x465   : > { %v1706_v45 = vpop.eup %1705 }
 0x49b   : > { %v670_v17 = vpop.xlane.xlu0 %669 }
 0x49c   : > { %v672_v30 = vadd.f32 %v670_v17, %v664_v18  ;;  %v667_v31 = vpop.xlane.xlu1 %666  ;;  %v1772_v18 = vmov (!%p1538_p8), 3  }
 0x49d   : > { %v671_v32 = vadd.f32 %v667_v31, %v663_v29 }
 0x49e   : > { %675 = vst.msk [vmem:[#allocation3 + $0x8] sm:$0xff] %vm673_vm4, %v672_v30 }
 0x49f   : > { %674 = vst.msk [vmem:[#allocation3] sm:$0xff] %vm673_vm4, %v671_v32 }
 0x4a5   : > { %v880_v34 = vld [vmem:[#allocation3 + $0x8] sm:$0xff] }
 0x4a6   : > { %v879_v33 = vld [vmem:[#allocation3] sm:$0xff]  ;;  %v915_v40 = vpop.xlane.xlu1 %914  ;;  %v912_v41 = vmul.f32 %v1991_v28, %v880_v34 }
 0x4a7   : > { %v911_v35 = vmul.f32 %v1994_v13, %v879_v33 }
 0x4a9   : > { %v919_v25 = vadd.f32 %v915_v40, %v911_v35 }
 0x4aa   : > { %v918_v27 = vpop.xlane.xlu0 %917 }
 0x4ab   : > { %922 = vst.msk [vmem:[#allocation3] sm:$0xff] %vm921_vm5, %v919_v25  ;;  %v920_v44 = vadd.f32 %v918_v27, %v912_v41 }
 0x4ad   : > { %923 = vst.msk [vmem:[#allocation3 + $0x8] sm:$0xff] %vm921_vm5, %v920_v44 }
 0x4b2   : > { %v1126_v58 = vld [vmem:[#allocation3] sm:$0xff] }
 0x4b3   : > { %v1158_v47 = vmul.f32 %v2024_v20, %v1126_v58 }
 0x4b4   : > { %v1127_v48 = vld [vmem:[#allocation3 + $0x8] sm:$0xff] }
 0x4b5   : > { %v1159_v38 = vmul.f32 %v1706_v45, %v1127_v48 }
 0x4b6   : > { %v1165_v5 = vpop.xlane.xlu0 %1164 }
 0x4b7   : > { %v1167_v6 = vadd.f32 %v1165_v5, %v1159_v38 }
 0x4b9   : > { %1170 = vst.msk [vmem:[#allocation3 + $0x8] sm:$0xff] %vm1168_vm6, %v1167_v6 }
 0x4be   : > { %v1260_v21 = vpop.permute.xlu0 %1259 }
 0x4c0   : > { %v1289_v37 = vld [vmem:[#allocation3 + $0x8] sm:$0xff] (!%p1538_p8) }
 0x4e6   : > { %v1586_v11 = vpop.f32.mrb[2].mxu0 }
 0x4e7   : > { %779 = vrot.lane.b32.xlu1 %v1586_v11, %s1766_s13  ;;  %v752_v13 = vpop.f32.mrb[3].mxu0 }
 0x4eb   : > { %777 = vrot.lane.b32.xlu1 %v752_v13, %s1766_s13 }
 0x4f2   : > { %v1596_v28 = vpop.f32.mrb[4].mxu0 }
 0x4f3   : > { %v999_v39 = vpop.f32.mrb[5].mxu0 }
 0x4fb   : > { %v1606_v49 = vpop.f32.mrb[6].mxu0 }
 0x4fc   : > { %v1246_v43 = vpop.f32.mrb[7].mxu0 }
 0x4fd   : > { %1271 = vrot.lane.b32.xlu0 %v1246_v43, %s1767_s19 }
 0x50f   : > { %1161 = vadd.xlane.f32.xlu1 %v1160_v50 }
 0x520   : > { %1026 = vrot.lane.b32.xlu1 %v1596_v28, %s1768_s20 }
 0x524   : > { %1024 = vrot.lane.b32.xlu1 %v999_v39, %s1768_s20 }
 0x528   : > { %1264 = vperm.xlu1 %1674, %v1706_v45  }
 0x52c   : > { %1273 = vrot.lane.b32.xlu1 %v1606_v49, %s1767_s19 }
 0x52d   : > { %1708 = vset.pattern.permute.xlu1 (!%p1538_p8), %v1770_v12 }
 0x559   : > { %v780_v52 = vpop.permute.xlu1 %779 }
 0x55a   : > { %v784_v53 = vadd.f32 %v780_v52, %v774_v42 }
 0x55c   : > { %787 = vst.msk [vmem:[#allocation4 + $0x8] sm:$0xff] %vm785_vm7, %v784_v53 }
 0x55d   : > { %v778_v56 = vpop.permute.xlu1 %777 }
 0x55e   : > { %v783_v57 = vadd.f32 %v778_v56, %v773_v55 }
 0x560   : > { %786 = vst.msk [vmem:[#allocation4] sm:$0xff] %vm785_vm7, %v783_v57 }
 0x563   : > { %v1009_v46 = vld [vmem:[#allocation4 + $0x8] sm:$0xff] }
 0x564   : > { %v1021_v61 = vmul.f32 %v2031_v10, %v1009_v46  ;;  %v1769_v10 = vmov (!%p1538_p8), 0  }
 0x565   : > { %1707 = vset.pattern.permute.xlu0 (!%p1538_p8), %v1769_v10 }
 0x567   : > { %v1008_v63 = vld [vmem:[#allocation4] sm:$0xff] }
 0x568   : > { %v1020_v1 = vmul.f32 %v2033_v26, %v1008_v63 }
 0x56f   : > { %v1272_v7 = vpop.permute.xlu0 %1271 }
 0x59c   : > { %v1162_v59 = vpop.xlane.xlu1 %1161 }
 0x59d   : > { %v1166_v60 = vadd.f32 %v1162_v59, %v1158_v47 }
 0x59f   : > { %1169 = vst.msk [vmem:[#allocation3] sm:$0xff] %vm1168_vm6, %v1166_v60 }
 0x5a0   : > { %v1027_v62 = vpop.permute.xlu1 %1026 }
 0x5a1   : > { %v1031_v0 = vadd.f32 %v1027_v62, %v1021_v61 }
 0x5a3   : > { %1034 = vst.msk [vmem:[#allocation4 + $0x8] sm:$0xff] %vm1032_vm8, %v1031_v0 }
 0x5a4   : > { %v1025_v2 = vpop.permute.xlu1 %1024 }
 0x5a5   : > { %v1030_v3 = vadd.f32 %v1025_v2, %v1020_v1 }
 0x5a6   : > { %v1288_v19 = vld [vmem:[#allocation3] sm:$0xff] (!%p1538_p8) }
 0x5a7   : > { %1033 = vst.msk [vmem:[#allocation4] sm:$0xff] %vm1032_vm8, %v1030_v3  ;;  %1713 = vrcp.f32 (!%p1538_p8), %v1288_v19 }
 0x5a8   : > { %v1265_v4 = vpop.permute.xlu1 %1264  ;;  %1715 = vrcp.f32 (!%p1538_p8), %v1289_v37 }
 0x5aa   : > { %v1256_v15 = vld [vmem:[#allocation4 + $0x8] sm:$0xff] }
 0x5ab   : > { %v1268_v20 = vmul.f32 %v1265_v4, %v1256_v15 }
 0x5ac   : > { %v1274_v22 = vpop.permute.xlu1 %1273 }
 0x5ad   : > { %v1278_v23 = vadd.f32 %v1274_v22, %v1268_v20  ;;  %1287 = sbr.rel (%p1538_p8) target bundleno = 1631 (0x65f), region = 40 }
 0x5ae   : > { %v1255_v24 = vld [vmem:[#allocation4] sm:$0xff] }
 0x5af   : > { %v1267_v9 = vmul.f32 %v1260_v21, %v1255_v24  ;;  %1281 = vst.msk [vmem:[#allocation4 + $0x8] sm:$0xff] %vm1279_vm9, %v1278_v23 }
 0x5b1   : > { %v1277_v8 = vadd.f32 %v1272_v7, %v1267_v9  ;;  %v1714_v14 = vpop.eup (!%p1538_p8), %1713 }
 0x5b2   : > { %1296 = vperm.xlu0 (!%p1538_p8), %1707, %v1714_v14   ;;  %1316 = vperm.xlu1 (!%p1538_p8), %1708, %v1714_v14   ;;  %v1716_v26 = vpop.eup (!%p1538_p8), %1715 }
 0x5b3   : > { %1280 = vst.msk [vmem:[#allocation4] sm:$0xff] %vm1279_vm9, %v1277_v8 }
 0x5b6   : > { %1301 = vperm.xlu0 %1707, %v1716_v26   ;;  %1321 = vperm.xlu1 %1708, %v1716_v26   ;;  %v1293_v31 = vld [vmem:[#allocation4 + $0x8] sm:$0xff] }
 0x5ba   : > { %1709 = vset.pattern.permute.xlu0 %v1771_v16  ;;  %1710 = vset.pattern.permute.xlu1 %v1771_v16  ;;  %v1292_v17 = vld [vmem:[#allocation4] sm:$0xff] }
 0x5bb   : > { %1336 = vperm.xlu0 %1709, %v1714_v14   ;;  %1341 = vperm.xlu1 %1710, %v1716_v26  }
 0x5bf   : > { %1711 = vset.pattern.permute.xlu1 %v1772_v18  ;;  %1712 = vset.pattern.permute.xlu0 %v1772_v18 }
 0x5c0   : > { %1356 = vperm.xlu1 %1711, %v1714_v14   ;;  %1361 = vperm.xlu0 %1712, %v1716_v26  }
 0x631   : > { %v1297_v29 = vpop.permute.xlu0 %1296  ;;  %v1317_v33 = vpop.permute.xlu1 %1316 }
 0x632   : > { %v1304_v30 = vmul.f32 %v1297_v29, %v1292_v17 }
 0x634   : > { %1306 = vst.msk [vmem:[#allocation4] sm:$0xff] %vm309_vm2, %v1304_v30 }
 0x635   : > { %v1302_v32 = vpop.permute.xlu0 %1301  ;;  %v1322_v40 = vpop.permute.xlu1 %1321 }
 0x636   : > { %v1305_v36 = vmul.f32 %v1302_v32, %v1293_v31 }
 0x638   : > { %1307 = vst.msk [vmem:[#allocation4 + $0x8] sm:$0xff] %vm309_vm2, %v1305_v36 }
 0x63a   : > { %v1337_v27 = vpop.permute.xlu0 %1336  ;;  %v1342_v48 = vpop.permute.xlu1 %1341 }
 0x63b   : > { %v1312_v34 = vld [vmem:[#allocation4] sm:$0xff] }
 0x63c   : > { %v1324_v35 = vmul.f32 %v1317_v33, %v1312_v34 }
 0x63e   : > { %1326 = vst.msk [vmem:[#allocation4] sm:$0xff] %vm785_vm7, %v1324_v35 }
 0x63f   : > { %v1313_v25 = vld [vmem:[#allocation4 + $0x8] sm:$0xff]  ;;  %v1357_v6 = vpop.permute.xlu1 %1356  ;;  %v1362_v28 = vpop.permute.xlu0 %1361 }
 0x640   : > { %v1325_v41 = vmul.f32 %v1322_v40, %v1313_v25 }
 0x642   : > { %1327 = vst.msk [vmem:[#allocation4 + $0x8] sm:$0xff] %vm785_vm7, %v1325_v41 }
 0x645   : > { %v1332_v44 = vld [vmem:[#allocation4] sm:$0xff] }
 0x646   : > { %v1344_v45 = vmul.f32 %v1337_v27, %v1332_v44 }
 0x648   : > { %1346 = vst.msk [vmem:[#allocation4] sm:$0xff] %vm1032_vm8, %v1344_v45 }
 0x649   : > { %v1333_v38 = vld [vmem:[#allocation4 + $0x8] sm:$0xff] }
 0x64a   : > { %v1345_v5 = vmul.f32 %v1342_v48, %v1333_v38 }
 0x64c   : > { %1347 = vst.msk [vmem:[#allocation4 + $0x8] sm:$0xff] %vm1032_vm8, %v1345_v5 }
 0x64f   : > { %v1352_v11 = vld [vmem:[#allocation4] sm:$0xff] }
 0x650   : > { %v1364_v13 = vmul.f32 %v1357_v6, %v1352_v11 }
 0x652   : > { %1366 = vst.msk [vmem:[#allocation4] sm:$0xff] %vm1279_vm9, %v1364_v13 }
 0x653   : > { %v1353_v39 = vld [vmem:[#allocation4 + $0x8] sm:$0xff] }
 0x654   : > { %v1365_v49 = vmul.f32 %v1362_v28, %v1353_v39 }
 0x656   : > { %1367 = vst.msk [vmem:[#allocation4 + $0x8] sm:$0xff] %vm1279_vm9, %v1365_v49 }
 0x659   : > { %v1368_v43 = vld [vmem:[#allocation4] sm:$0xff] }
 0x65a   : > { %1371 = vst.msk [vmem:[%s1833_s29] sm:$0xff] %vm1370_vm10, %v1368_v43 }
 0x65d   : > { %v1369_v50 = vld [vmem:[#allocation4 + $0x8] sm:$0xff] }
 0x65e   : > { %1372 = vst.msk [vmem:[%s1833_s29 + $0x8] sm:$0xff] %vm1370_vm10, %v1369_v50 }
 0x65f PF: > { %s13_s16 = sadd.s32 1, %s1755_s16   ;;  %s2089_s12 = smov %s1747_s14 }
 0x660   : > { %p10_p9 = scmp.ge.s32.totalorder %s13_s16, 6   ;;  %s2090_s13 = smov %s1751_s15 }
 0x661   : > { %s2091_s14 = smov %s2094_s17  ;;  %s2092_s15 = smov %s2098_s18 }
 0x662   :  { %12 = sbr.rel (!%p10_p9) target bundleno = 3 (0x3), region = 76 }

</bundles_post_ra>
